<compile_context>
chip_gen: v5e
topology: v5e:2x2
jax: 0.10.0
libtpu: 0.0.40
codegen_flags: <defaults>
</compile_context>

<pallas_src>
import math

import jax
import jax.numpy as jnp
from jax.experimental import pallas as pl
from jax.experimental.pallas import tpu as pltpu

# ----------------------------- tiny Llama config -----------------------------
VOCAB = 128
HIDDEN = 64
N_HEADS = 4
HEAD_DIM = HIDDEN // N_HEADS          # 16
INTERMEDIATE = 128
N_LAYERS = 2
N_ENCODERS = 2                        # query encoder + doc encoder
EPS = 1e-5
ROPE_BASE = 10000.0


# ------------------------------- kernel helpers -------------------------------
def _rms(x, w):
    """Llama RMSNorm on [M, H] (w broadcastable [1, H])."""
    var = jnp.mean(x * x, axis=-1, keepdims=True)
    return x * jax.lax.rsqrt(var + EPS) * w


# --------------------------- fused encoder kernel ------------------------------
def _dense_encoder_kernel(x_ref, bias_ref, cos_ref, sin_ref,
                          ln1_ref, wqkv_ref, wo_ref,
                          ln2_ref, wgu_ref, wd_ref, fnorm_ref,
                          o_ref):
    """One grid point = one full encoder (all layers, all batches, all heads).

    x_ref    : [1, B*S, H]      embeddings
    bias_ref : [1, M, M]        block-diag causal+pad bias, M = n_heads*B*S
    cos/sin  : [M, D]           RoPE tables tiled to the heads-on-M row order
    ln1/ln2  : [1, L, 1, H]
    wqkv     : [1, L, H, 3H]    wq|wk|wv fused
    wo       : [1, L, H, H]
    wgu      : [1, L, H, 2I]    w_gate|w_up fused
    wd       : [1, L, I, H]
    fnorm    : [1, 1, H]
    o_ref    : [1, B, H]        pooled (token 0) embeddings after final norm
    """
    BS, H = x_ref.shape[1], x_ref.shape[2]
    B = o_ref.shape[1]
    S = BS // B
    L = wqkv_ref.shape[1]
    NH = N_HEADS
    D = H // NH
    inter = wd_ref.shape[2]
    scale = 1.0 / math.sqrt(D)

    x = x_ref[0].astype(jnp.float32)                   # [BS, H] residual stream
    bias = bias_ref[0]                                 # [M, M]
    cos = cos_ref[...]                                 # [M, D]
    sin = sin_ref[...]

    def split_heads(t):                                # [BS, H] -> [NH*BS, D], rows (h, b, s)
        return jnp.concatenate([t[:, i * D:(i + 1) * D] for i in range(NH)], axis=0)

    def merge_heads(t):                                # [NH*BS, D] -> [BS, H]
        return jnp.concatenate([t[i * BS:(i + 1) * BS, :] for i in range(NH)], axis=1)

    def rope(t):                                       # rotate-half RoPE on the whole slab
        rh = jnp.concatenate([-t[:, D // 2:], t[:, :D // 2]], axis=-1)
        return t * cos + rh * sin

    for l in range(L):                                 # static unroll, L = 2
        # ------------------------------ attention ------------------------------
        h = _rms(x, ln1_ref[0, l])                                             # [BS, H]
        qkv = jnp.dot(h, wqkv_ref[0, l], preferred_element_type=jnp.float32)   # [BS, 3H]
        qm = rope(split_heads(qkv[:, :H]))                                     # [M, D]
        km = rope(split_heads(qkv[:, H:2 * H]))                                # [M, D]
        vm = split_heads(qkv[:, 2 * H:])                                       # [M, D]

        s = jax.lax.dot_general(qm, km, (((1,), (1,)), ((), ())),
                                preferred_element_type=jnp.float32) * scale + bias  # [M, M]
        s = s - jnp.max(s, axis=-1, keepdims=True)
        p = jnp.exp(s)                                  # masked entries underflow to exactly 0
        p = p * pl.reciprocal(jnp.sum(p, axis=-1, keepdims=True), approx=True)
        attn = merge_heads(jnp.dot(p, vm, preferred_element_type=jnp.float32))  # [BS, H]
        x = x + jnp.dot(attn, wo_ref[0, l], preferred_element_type=jnp.float32)

        # ------------------------------ SwiGLU MLP ------------------------------
        h = _rms(x, ln2_ref[0, l])
        gu = jnp.dot(h, wgu_ref[0, l], preferred_element_type=jnp.float32)      # [BS, 2I]
        g = gu[:, :inter]
        u = gu[:, inter:]
        x = x + jnp.dot(g * jax.lax.logistic(g) * u, wd_ref[0, l],
                        preferred_element_type=jnp.float32)

    # -------------- fused final RMSNorm + token-0 (CLS) pooling --------------
    # RMSNorm is per-position, so normalizing only the pooled row equals
    # final_norm(full hidden state)[:, 0, :].
    x0 = x.reshape(B, S, H)[:, 0, :]                                            # [B, H]
    var = jnp.mean(x0 * x0, axis=-1, keepdims=True)
    o_ref[0] = (x0 * jax.lax.rsqrt(var + EPS) * fnorm_ref[0]).astype(o_ref.dtype)


def encoder_stack_pooled(x, bias, cos, sin, layers, final_norm, batch):
    """x: [E, B*S, H] -> pooled [E, B, H] (final-normed hidden state of token 0)."""
    E, BS, H = x.shape
    L = layers["w_qkv"].shape[1]
    M = bias.shape[1]
    D = cos.shape[1]
    inter = layers["w_d"].shape[2]
    return pl.pallas_call(
        _dense_encoder_kernel,
        out_shape=jax.ShapeDtypeStruct((E, batch, H), x.dtype),
        grid=(E,),
        in_specs=[
            pl.BlockSpec((1, BS, H), lambda e: (e, 0, 0)),               # embeddings
            pl.BlockSpec((1, M, M), lambda e: (e, 0, 0)),                # attention bias
            pl.BlockSpec((M, D), lambda e: (0, 0)),                      # rope cos
            pl.BlockSpec((M, D), lambda e: (0, 0)),                      # rope sin
            pl.BlockSpec((1, L, 1, H), lambda e: (e, 0, 0, 0)),          # ln1 (all layers)
            pl.BlockSpec((1, L, H, 3 * H), lambda e: (e, 0, 0, 0)),      # w_qkv (all layers)
            pl.BlockSpec((1, L, H, H), lambda e: (e, 0, 0, 0)),          # w_o
            pl.BlockSpec((1, L, 1, H), lambda e: (e, 0, 0, 0)),          # ln2
            pl.BlockSpec((1, L, H, 2 * inter), lambda e: (e, 0, 0, 0)),  # w_gate_up
            pl.BlockSpec((1, L, inter, H), lambda e: (e, 0, 0, 0)),      # w_down
            pl.BlockSpec((1, 1, H), lambda e: (e, 0, 0)),                # final norm
        ],
        out_specs=pl.BlockSpec((1, batch, H), lambda e: (e, 0, 0)),
        compiler_params=pltpu.CompilerParams(dimension_semantics=("parallel",)),
    )(x, bias, cos, sin,
      layers["ln1"], layers["w_qkv"], layers["w_o"],
      layers["ln2"], layers["w_gu"], layers["w_d"], final_norm)


# ------------------------------- model (glue) --------------------------------
def _rope_tables(seq_len):
    pos = jnp.arange(seq_len, dtype=jnp.float32)
    inv_freq = 1.0 / (ROPE_BASE ** (jnp.arange(0, HEAD_DIM, 2, dtype=jnp.float32) / HEAD_DIM))
    freqs = pos[:, None] * inv_freq[None, :]
    emb = jnp.concatenate([freqs, freqs], axis=-1)     # [S, D]
    return jnp.cos(emb), jnp.sin(emb)


def dense_encoder_forward(params, q_ids, q_mask, d_ids, d_mask):
    """Returns (query_embeddings, doc_embeddings) = last_hidden_state[:, 0, :]."""
    ids = jnp.stack([q_ids, d_ids], axis=0)            # [E, B, S]
    mask = jnp.stack([q_mask, d_mask], axis=0)         # [E, B, S]
    E, B, S = ids.shape

    # Embedding gather (per-encoder tables) — plain JAX glue.
    x = jax.vmap(lambda tbl, i: jnp.take(tbl, i, axis=0))(params["embed"], ids)  # [E,B,S,H]
    x = x.reshape(E, B * S, HIDDEN)

    # Block-diagonal attention bias in the heads-on-M row order (h, b, s):
    # causal (Llama is a causal decoder) + key padding, -1e9 outside the
    # per-(head, sequence) diagonal blocks.  Layer-invariant -> built once here.
    M = N_HEADS * B * S
    r = jnp.arange(M)
    rb = (r // S) % B                                   # batch index of row/col
    rs = r % S                                          # sequence position
    rh = r // (B * S)                                   # head index
    same_block = (rb[:, None] == rb[None, :]) & (rh[:, None] == rh[None, :])
    causal = rs[None, :] <= rs[:, None]
    key_ok = mask[:, rb, rs] > 0                        # [E, M] key-padding per column
    allowed = same_block[None] & causal[None] & key_ok[:, None, :]
    bias = jnp.where(allowed, 0.0, -1e9).astype(jnp.float32)        # [E, M, M]

    cos, sin = _rope_tables(S)                          # [S, D]
    cos = jnp.tile(cos, (N_HEADS * B, 1))               # [M, D], rows (h, b, s)
    sin = jnp.tile(sin, (N_HEADS * B, 1))

    pooled = encoder_stack_pooled(x, bias, cos, sin,
                                  params["layers"], params["final_norm"], B)   # [E, B, H]
    return pooled[0], pooled[1]


# ------------------------------ parameter init --------------------------------
def init_dense_encoder_params(key):
    """Two independent encoders; per-layer weights stacked as [E, L, ...] so one
    BlockSpec fetch makes a whole encoder's stack VMEM-resident."""
    k = jax.random.split(key, 5)
    std = 0.02
    E, L = N_ENCODERS, N_LAYERS
    return {
        "embed": std * jax.random.normal(k[0], (E, VOCAB, HIDDEN), jnp.float32),
        "final_norm": jnp.ones((E, 1, HIDDEN), jnp.float32),
        "layers": {
            "ln1": jnp.ones((E, L, 1, HIDDEN), jnp.float32),
            "ln2": jnp.ones((E, L, 1, HIDDEN), jnp.float32),
            # wq|wk|wv concatenated along N; wg|wu concatenated along N.
            "w_qkv": std * jax.random.normal(k[1], (E, L, HIDDEN, 3 * HIDDEN), jnp.float32),
            "w_o":   std * jax.random.normal(k[2], (E, L, HIDDEN, HIDDEN), jnp.float32),
            "w_gu":  std * jax.random.normal(k[3], (E, L, HIDDEN, 2 * INTERMEDIATE), jnp.float32),
            "w_d":   std * jax.random.normal(k[4], (E, L, INTERMEDIATE, HIDDEN), jnp.float32),
        },
    }


# ------------------------------------ main -------------------------------------
if __name__ == "__main__":
    B, S = 2, 8
    root = jax.random.PRNGKey(0)
    kp, kq, kd = jax.random.split(root, 3)

    params = init_dense_encoder_params(kp)

    query_input_ids = jax.random.randint(kq, (B, S), 0, VOCAB, dtype=jnp.int32)
    doc_input_ids = jax.random.randint(kd, (B, S), 0, VOCAB, dtype=jnp.int32)
    # second sequence in each batch has 2 padding tokens at the end
    base_mask = jnp.ones((B, S), dtype=jnp.int32)
    query_attention_mask = base_mask.at[1, -2:].set(0)
    doc_attention_mask = base_mask.at[1, -2:].set(0)

    fwd = jax.jit(dense_encoder_forward)
    q_emb, d_emb = fwd(params, query_input_ids, query_attention_mask,
                       doc_input_ids, doc_attention_mask)
    jax.block_until_ready((q_emb, d_emb))

    assert q_emb.shape == (B, HIDDEN) and d_emb.shape == (B, HIDDEN)
    assert jnp.all(jnp.isfinite(q_emb)) and jnp.all(jnp.isfinite(d_emb))
    print("KERNEL_OK")
</pallas_src>

<mosaic_0001>
module attributes {stable_mosaic.version = 11 : i64} {
  func.func @_dense_encoder_kernel(%arg0: i32, %arg1: memref<1x16x64xf32, #tpu.memory_space<vmem>>, %arg2: memref<1x64x64xf32, #tpu.memory_space<vmem>>, %arg3: memref<64x16xf32, #tpu.memory_space<vmem>>, %arg4: memref<64x16xf32, #tpu.memory_space<vmem>>, %arg5: memref<1x2x1x64xf32, #tpu.memory_space<vmem>>, %arg6: memref<1x2x64x192xf32, #tpu.memory_space<vmem>>, %arg7: memref<1x2x64x64xf32, #tpu.memory_space<vmem>>, %arg8: memref<1x2x1x64xf32, #tpu.memory_space<vmem>>, %arg9: memref<1x2x64x256xf32, #tpu.memory_space<vmem>>, %arg10: memref<1x2x128x64xf32, #tpu.memory_space<vmem>>, %arg11: memref<1x1x64xf32, #tpu.memory_space<vmem>>, %arg12: memref<1x2x64xf32, #tpu.memory_space<vmem>>) attributes {dimension_semantics = [#tpu.dimension_semantics<parallel>], iteration_bounds = array<i64: 2>, scalar_prefetch = 0 : i64, scratch_operands = 0 : i64, tpu.core_type = #tpu.core_type<tc>, window_params = [{transform_indices = @transform_0, window_bounds = array<i64: 1, 16, 64>}, {transform_indices = @transform_1, window_bounds = array<i64: 1, 64, 64>}, {pipeline_mode = #tpu.pipeline_mode<synchronous>, transform_indices = @transform_2, window_bounds = array<i64: 64, 16>}, {pipeline_mode = #tpu.pipeline_mode<synchronous>, transform_indices = @transform_3, window_bounds = array<i64: 64, 16>}, {transform_indices = @transform_4, window_bounds = array<i64: 1, 2, 1, 64>}, {transform_indices = @transform_5, window_bounds = array<i64: 1, 2, 64, 192>}, {transform_indices = @transform_6, window_bounds = array<i64: 1, 2, 64, 64>}, {transform_indices = @transform_7, window_bounds = array<i64: 1, 2, 1, 64>}, {transform_indices = @transform_8, window_bounds = array<i64: 1, 2, 64, 256>}, {transform_indices = @transform_9, window_bounds = array<i64: 1, 2, 128, 64>}, {transform_indices = @transform_10, window_bounds = array<i64: 1, 1, 64>}, {transform_indices = @transform_11, window_bounds = array<i64: 1, 2, 64>}]} {
    %c0 = arith.constant 0 : index
    %c0_0 = arith.constant 0 : index
    %c0_1 = arith.constant 0 : index
    %0 = vector.load %arg1[%c0, %c0_0, %c0_1] : memref<1x16x64xf32, #tpu.memory_space<vmem>>, vector<1x16x64xf32>
    %1 = vector.shape_cast %0 : vector<1x16x64xf32> to vector<16x64xf32>
    %c0_2 = arith.constant 0 : index
    %c0_3 = arith.constant 0 : index
    %c0_4 = arith.constant 0 : index
    %2 = vector.load %arg2[%c0_2, %c0_3, %c0_4] : memref<1x64x64xf32, #tpu.memory_space<vmem>>, vector<1x64x64xf32>
    %3 = vector.shape_cast %2 : vector<1x64x64xf32> to vector<64x64xf32>
    %c0_5 = arith.constant 0 : index
    %c0_6 = arith.constant 0 : index
    %4 = vector.load %arg3[%c0_5, %c0_6] : memref<64x16xf32, #tpu.memory_space<vmem>>, vector<64x16xf32>
    %c0_7 = arith.constant 0 : index
    %c0_8 = arith.constant 0 : index
    %5 = vector.load %arg4[%c0_7, %c0_8] : memref<64x16xf32, #tpu.memory_space<vmem>>, vector<64x16xf32>
    %c0_9 = arith.constant 0 : index
    %c0_10 = arith.constant 0 : index
    %c0_11 = arith.constant 0 : index
    %c0_12 = arith.constant 0 : index
    %6 = vector.load %arg5[%c0_9, %c0_10, %c0_11, %c0_12] : memref<1x2x1x64xf32, #tpu.memory_space<vmem>>, vector<1x1x1x64xf32>
    %7 = vector.shape_cast %6 : vector<1x1x1x64xf32> to vector<1x64xf32>
    %8 = arith.mulf %1, %1 : vector<16x64xf32>
    %cst = arith.constant dense<0.000000e+00> : vector<16xf32>
    %9 = vector.multi_reduction <add>, %8, %cst [1] : vector<16x64xf32> to vector<16xf32>
    %10 = vector.shape_cast %9 : vector<16xf32> to vector<16x1xf32>
    %cst_13 = arith.constant 6.400000e+01 : f32
    %11 = vector.broadcast %cst_13 : f32 to vector<16x1xf32>
    %12 = arith.divf %10, %11 : vector<16x1xf32>
    %cst_14 = arith.constant 9.99999974E-6 : f32
    %13 = vector.broadcast %cst_14 : f32 to vector<16x1xf32>
    %14 = arith.addf %12, %13 : vector<16x1xf32>
    %15 = math.rsqrt %14 : vector<16x1xf32>
    %16 = vector.broadcast %15 : vector<16x1xf32> to vector<16x64xf32>
    %17 = arith.mulf %1, %16 : vector<16x64xf32>
    %18 = vector.broadcast %7 : vector<1x64xf32> to vector<16x64xf32>
    %19 = arith.mulf %17, %18 : vector<16x64xf32>
    %c0_15 = arith.constant 0 : index
    %c0_16 = arith.constant 0 : index
    %c0_17 = arith.constant 0 : index
    %c0_18 = arith.constant 0 : index
    %20 = vector.load %arg6[%c0_15, %c0_16, %c0_17, %c0_18] : memref<1x2x64x192xf32, #tpu.memory_space<vmem>>, vector<1x1x64x192xf32>
    %21 = vector.shape_cast %20 : vector<1x1x64x192xf32> to vector<64x192xf32>
    %cst_19 = arith.constant dense<0.000000e+00> : vector<16x192xf32>
    %22 = tpu.matmul %19, %21, %cst_19 {dimension_numbers = #tpu.dot_dimension_numbers<[1], [0], [0], [1], [0, 0, 1, 1], [], []>} : vector<16x64xf32>, vector<64x192xf32>, vector<16x192xf32> -> vector<16x192xf32>
    %23 = vector.extract_strided_slice %22 {offsets = [0, 0], sizes = [16, 64], strides = [1, 1]} : vector<16x192xf32> to vector<16x64xf32>
    %24 = vector.extract_strided_slice %23 {offsets = [0, 0], sizes = [16, 16], strides = [1, 1]} : vector<16x64xf32> to vector<16x16xf32>
    %25 = vector.extract_strided_slice %23 {offsets = [0, 16], sizes = [16, 16], strides = [1, 1]} : vector<16x64xf32> to vector<16x16xf32>
    %26 = vector.extract_strided_slice %23 {offsets = [0, 32], sizes = [16, 16], strides = [1, 1]} : vector<16x64xf32> to vector<16x16xf32>
    %27 = vector.extract_strided_slice %23 {offsets = [0, 48], sizes = [16, 16], strides = [1, 1]} : vector<16x64xf32> to vector<16x16xf32>
    %28 = tpu.concatenate %24, %25, %26, %27 in 0 : vector<16x16xf32>, vector<16x16xf32>, vector<16x16xf32>, vector<16x16xf32> -> vector<64x16xf32>
    %29 = vector.extract_strided_slice %28 {offsets = [0, 8], sizes = [64, 8], strides = [1, 1]} : vector<64x16xf32> to vector<64x8xf32>
    %cst_20 = arith.constant 0.000000e+00 : f32
    %30 = vector.broadcast %cst_20 : f32 to vector<64x8xf32>
    %31 = arith.subf %30, %29 : vector<64x8xf32>
    %32 = vector.extract_strided_slice %28 {offsets = [0, 0], sizes = [64, 8], strides = [1, 1]} : vector<64x16xf32> to vector<64x8xf32>
    %33 = tpu.concatenate %31, %32 in 1 : vector<64x8xf32>, vector<64x8xf32> -> vector<64x16xf32>
    %34 = arith.mulf %28, %4 : vector<64x16xf32>
    %35 = arith.mulf %33, %5 : vector<64x16xf32>
    %36 = arith.addf %34, %35 : vector<64x16xf32>
    %37 = vector.extract_strided_slice %22 {offsets = [0, 64], sizes = [16, 64], strides = [1, 1]} : vector<16x192xf32> to vector<16x64xf32>
    %38 = vector.extract_strided_slice %37 {offsets = [0, 0], sizes = [16, 16], strides = [1, 1]} : vector<16x64xf32> to vector<16x16xf32>
    %39 = vector.extract_strided_slice %37 {offsets = [0, 16], sizes = [16, 16], strides = [1, 1]} : vector<16x64xf32> to vector<16x16xf32>
    %40 = vector.extract_strided_slice %37 {offsets = [0, 32], sizes = [16, 16], strides = [1, 1]} : vector<16x64xf32> to vector<16x16xf32>
    %41 = vector.extract_strided_slice %37 {offsets = [0, 48], sizes = [16, 16], strides = [1, 1]} : vector<16x64xf32> to vector<16x16xf32>
    %42 = tpu.concatenate %38, %39, %40, %41 in 0 : vector<16x16xf32>, vector<16x16xf32>, vector<16x16xf32>, vector<16x16xf32> -> vector<64x16xf32>
    %43 = vector.extract_strided_slice %42 {offsets = [0, 8], sizes = [64, 8], strides = [1, 1]} : vector<64x16xf32> to vector<64x8xf32>
    %cst_21 = arith.constant 0.000000e+00 : f32
    %44 = vector.broadcast %cst_21 : f32 to vector<64x8xf32>
    %45 = arith.subf %44, %43 : vector<64x8xf32>
    %46 = vector.extract_strided_slice %42 {offsets = [0, 0], sizes = [64, 8], strides = [1, 1]} : vector<64x16xf32> to vector<64x8xf32>
    %47 = tpu.concatenate %45, %46 in 1 : vector<64x8xf32>, vector<64x8xf32> -> vector<64x16xf32>
    %48 = arith.mulf %42, %4 : vector<64x16xf32>
    %49 = arith.mulf %47, %5 : vector<64x16xf32>
    %50 = arith.addf %48, %49 : vector<64x16xf32>
    %51 = vector.extract_strided_slice %22 {offsets = [0, 128], sizes = [16, 64], strides = [1, 1]} : vector<16x192xf32> to vector<16x64xf32>
    %52 = vector.extract_strided_slice %51 {offsets = [0, 0], sizes = [16, 16], strides = [1, 1]} : vector<16x64xf32> to vector<16x16xf32>
    %53 = vector.extract_strided_slice %51 {offsets = [0, 16], sizes = [16, 16], strides = [1, 1]} : vector<16x64xf32> to vector<16x16xf32>
    %54 = vector.extract_strided_slice %51 {offsets = [0, 32], sizes = [16, 16], strides = [1, 1]} : vector<16x64xf32> to vector<16x16xf32>
    %55 = vector.extract_strided_slice %51 {offsets = [0, 48], sizes = [16, 16], strides = [1, 1]} : vector<16x64xf32> to vector<16x16xf32>
    %56 = tpu.concatenate %52, %53, %54, %55 in 0 : vector<16x16xf32>, vector<16x16xf32>, vector<16x16xf32>, vector<16x16xf32> -> vector<64x16xf32>
    %cst_22 = arith.constant dense<0.000000e+00> : vector<64x64xf32>
    %57 = tpu.matmul %36, %50, %cst_22 {dimension_numbers = #tpu.dot_dimension_numbers<[1], [1], [0], [0], [0, 0, 1, 0], [], []>} : vector<64x16xf32>, vector<64x16xf32>, vector<64x64xf32> -> vector<64x64xf32>
    %cst_23 = arith.constant 2.500000e-01 : f32
    %58 = vector.broadcast %cst_23 : f32 to vector<64x64xf32>
    %59 = arith.mulf %57, %58 : vector<64x64xf32>
    %60 = arith.addf %59, %3 : vector<64x64xf32>
    %cst_24 = arith.constant dense<0xFF800000> : vector<64xf32>
    %61 = vector.multi_reduction <maximumf>, %60, %cst_24 [1] : vector<64x64xf32> to vector<64xf32>
    %62 = vector.shape_cast %61 : vector<64xf32> to vector<64x1xf32>
    %63 = vector.broadcast %62 : vector<64x1xf32> to vector<64x64xf32>
    %64 = arith.subf %60, %63 : vector<64x64xf32>
    %65 = math.exp %64 : vector<64x64xf32>
    %cst_25 = arith.constant dense<0.000000e+00> : vector<64xf32>
    %66 = vector.multi_reduction <add>, %65, %cst_25 [1] : vector<64x64xf32> to vector<64xf32>
    %67 = vector.shape_cast %66 : vector<64xf32> to vector<64x1xf32>
    %68 = tpu.reciprocal %67 {approx = true} : vector<64x1xf32> -> vector<64x1xf32>
    %69 = vector.broadcast %68 : vector<64x1xf32> to vector<64x64xf32>
    %70 = arith.mulf %65, %69 : vector<64x64xf32>
    %cst_26 = arith.constant dense<0.000000e+00> : vector<64x16xf32>
    %71 = tpu.matmul %70, %56, %cst_26 {dimension_numbers = #tpu.dot_dimension_numbers<[1], [0], [0], [1], [0, 0, 1, 1], [], []>} : vector<64x64xf32>, vector<64x16xf32>, vector<64x16xf32> -> vector<64x16xf32>
    %72 = vector.extract_strided_slice %71 {offsets = [0, 0], sizes = [16, 16], strides = [1, 1]} : vector<64x16xf32> to vector<16x16xf32>
    %73 = vector.extract_strided_slice %71 {offsets = [16, 0], sizes = [16, 16], strides = [1, 1]} : vector<64x16xf32> to vector<16x16xf32>
    %74 = vector.extract_strided_slice %71 {offsets = [32, 0], sizes = [16, 16], strides = [1, 1]} : vector<64x16xf32> to vector<16x16xf32>
    %75 = vector.extract_strided_slice %71 {offsets = [48, 0], sizes = [16, 16], strides = [1, 1]} : vector<64x16xf32> to vector<16x16xf32>
    %76 = tpu.concatenate %72, %73, %74, %75 in 1 : vector<16x16xf32>, vector<16x16xf32>, vector<16x16xf32>, vector<16x16xf32> -> vector<16x64xf32>
    %c0_27 = arith.constant 0 : index
    %c0_28 = arith.constant 0 : index
    %c0_29 = arith.constant 0 : index
    %c0_30 = arith.constant 0 : index
    %77 = vector.load %arg7[%c0_27, %c0_28, %c0_29, %c0_30] : memref<1x2x64x64xf32, #tpu.memory_space<vmem>>, vector<1x1x64x64xf32>
    %78 = vector.shape_cast %77 : vector<1x1x64x64xf32> to vector<64x64xf32>
    %cst_31 = arith.constant dense<0.000000e+00> : vector<16x64xf32>
    %79 = tpu.matmul %76, %78, %cst_31 {dimension_numbers = #tpu.dot_dimension_numbers<[1], [0], [0], [1], [0, 0, 1, 1], [], []>} : vector<16x64xf32>, vector<64x64xf32>, vector<16x64xf32> -> vector<16x64xf32>
    %80 = arith.addf %1, %79 : vector<16x64xf32>
    %c0_32 = arith.constant 0 : index
    %c0_33 = arith.constant 0 : index
    %c0_34 = arith.constant 0 : index
    %c0_35 = arith.constant 0 : index
    %81 = vector.load %arg8[%c0_32, %c0_33, %c0_34, %c0_35] : memref<1x2x1x64xf32, #tpu.memory_space<vmem>>, vector<1x1x1x64xf32>
    %82 = vector.shape_cast %81 : vector<1x1x1x64xf32> to vector<1x64xf32>
    %83 = arith.mulf %80, %80 : vector<16x64xf32>
    %cst_36 = arith.constant dense<0.000000e+00> : vector<16xf32>
    %84 = vector.multi_reduction <add>, %83, %cst_36 [1] : vector<16x64xf32> to vector<16xf32>
    %85 = vector.shape_cast %84 : vector<16xf32> to vector<16x1xf32>
    %cst_37 = arith.constant 6.400000e+01 : f32
    %86 = vector.broadcast %cst_37 : f32 to vector<16x1xf32>
    %87 = arith.divf %85, %86 : vector<16x1xf32>
    %cst_38 = arith.constant 9.99999974E-6 : f32
    %88 = vector.broadcast %cst_38 : f32 to vector<16x1xf32>
    %89 = arith.addf %87, %88 : vector<16x1xf32>
    %90 = math.rsqrt %89 : vector<16x1xf32>
    %91 = vector.broadcast %90 : vector<16x1xf32> to vector<16x64xf32>
    %92 = arith.mulf %80, %91 : vector<16x64xf32>
    %93 = vector.broadcast %82 : vector<1x64xf32> to vector<16x64xf32>
    %94 = arith.mulf %92, %93 : vector<16x64xf32>
    %c0_39 = arith.constant 0 : index
    %c0_40 = arith.constant 0 : index
    %c0_41 = arith.constant 0 : index
    %c0_42 = arith.constant 0 : index
    %95 = vector.load %arg9[%c0_39, %c0_40, %c0_41, %c0_42] : memref<1x2x64x256xf32, #tpu.memory_space<vmem>>, vector<1x1x64x256xf32>
    %96 = vector.shape_cast %95 : vector<1x1x64x256xf32> to vector<64x256xf32>
    %cst_43 = arith.constant dense<0.000000e+00> : vector<16x256xf32>
    %97 = tpu.matmul %94, %96, %cst_43 {dimension_numbers = #tpu.dot_dimension_numbers<[1], [0], [0], [1], [0, 0, 1, 1], [], []>} : vector<16x64xf32>, vector<64x256xf32>, vector<16x256xf32> -> vector<16x256xf32>
    %98 = vector.extract_strided_slice %97 {offsets = [0, 0], sizes = [16, 128], strides = [1, 1]} : vector<16x256xf32> to vector<16x128xf32>
    %99 = vector.extract_strided_slice %97 {offsets = [0, 128], sizes = [16, 128], strides = [1, 1]} : vector<16x256xf32> to vector<16x128xf32>
    %100 = arith.negf %98 : vector<16x128xf32>
    %101 = math.exp %100 : vector<16x128xf32>
    %cst_44 = arith.constant 1.000000e+00 : f32
    %102 = vector.broadcast %cst_44 : f32 to vector<16x128xf32>
    %103 = arith.addf %102, %101 : vector<16x128xf32>
    %104 = arith.divf %102, %103 : vector<16x128xf32>
    %105 = arith.mulf %98, %104 : vector<16x128xf32>
    %106 = arith.mulf %105, %99 : vector<16x128xf32>
    %c0_45 = arith.constant 0 : index
    %c0_46 = arith.constant 0 : index
    %c0_47 = arith.constant 0 : index
    %c0_48 = arith.constant 0 : index
    %107 = vector.load %arg10[%c0_45, %c0_46, %c0_47, %c0_48] : memref<1x2x128x64xf32, #tpu.memory_space<vmem>>, vector<1x1x128x64xf32>
    %108 = vector.shape_cast %107 : vector<1x1x128x64xf32> to vector<128x64xf32>
    %cst_49 = arith.constant dense<0.000000e+00> : vector<16x64xf32>
    %109 = tpu.matmul %106, %108, %cst_49 {dimension_numbers = #tpu.dot_dimension_numbers<[1], [0], [0], [1], [0, 0, 1, 1], [], []>} : vector<16x128xf32>, vector<128x64xf32>, vector<16x64xf32> -> vector<16x64xf32>
    %110 = arith.addf %80, %109 : vector<16x64xf32>
    %c0_50 = arith.constant 0 : index
    %c1 = arith.constant 1 : index
    %c0_51 = arith.constant 0 : index
    %c0_52 = arith.constant 0 : index
    %111 = vector.load %arg5[%c0_50, %c1, %c0_51, %c0_52] : memref<1x2x1x64xf32, #tpu.memory_space<vmem>>, vector<1x1x1x64xf32>
    %112 = vector.shape_cast %111 : vector<1x1x1x64xf32> to vector<1x64xf32>
    %113 = arith.mulf %110, %110 : vector<16x64xf32>
    %cst_53 = arith.constant dense<0.000000e+00> : vector<16xf32>
    %114 = vector.multi_reduction <add>, %113, %cst_53 [1] : vector<16x64xf32> to vector<16xf32>
    %115 = vector.shape_cast %114 : vector<16xf32> to vector<16x1xf32>
    %cst_54 = arith.constant 6.400000e+01 : f32
    %116 = vector.broadcast %cst_54 : f32 to vector<16x1xf32>
    %117 = arith.divf %115, %116 : vector<16x1xf32>
    %cst_55 = arith.constant 9.99999974E-6 : f32
    %118 = vector.broadcast %cst_55 : f32 to vector<16x1xf32>
    %119 = arith.addf %117, %118 : vector<16x1xf32>
    %120 = math.rsqrt %119 : vector<16x1xf32>
    %121 = vector.broadcast %120 : vector<16x1xf32> to vector<16x64xf32>
    %122 = arith.mulf %110, %121 : vector<16x64xf32>
    %123 = vector.broadcast %112 : vector<1x64xf32> to vector<16x64xf32>
    %124 = arith.mulf %122, %123 : vector<16x64xf32>
    %c0_56 = arith.constant 0 : index
    %c1_57 = arith.constant 1 : index
    %c0_58 = arith.constant 0 : index
    %c0_59 = arith.constant 0 : index
    %125 = vector.load %arg6[%c0_56, %c1_57, %c0_58, %c0_59] : memref<1x2x64x192xf32, #tpu.memory_space<vmem>>, vector<1x1x64x192xf32>
    %126 = vector.shape_cast %125 : vector<1x1x64x192xf32> to vector<64x192xf32>
    %cst_60 = arith.constant dense<0.000000e+00> : vector<16x192xf32>
    %127 = tpu.matmul %124, %126, %cst_60 {dimension_numbers = #tpu.dot_dimension_numbers<[1], [0], [0], [1], [0, 0, 1, 1], [], []>} : vector<16x64xf32>, vector<64x192xf32>, vector<16x192xf32> -> vector<16x192xf32>
    %128 = vector.extract_strided_slice %127 {offsets = [0, 0], sizes = [16, 64], strides = [1, 1]} : vector<16x192xf32> to vector<16x64xf32>
    %129 = vector.extract_strided_slice %128 {offsets = [0, 0], sizes = [16, 16], strides = [1, 1]} : vector<16x64xf32> to vector<16x16xf32>
    %130 = vector.extract_strided_slice %128 {offsets = [0, 16], sizes = [16, 16], strides = [1, 1]} : vector<16x64xf32> to vector<16x16xf32>
    %131 = vector.extract_strided_slice %128 {offsets = [0, 32], sizes = [16, 16], strides = [1, 1]} : vector<16x64xf32> to vector<16x16xf32>
    %132 = vector.extract_strided_slice %128 {offsets = [0, 48], sizes = [16, 16], strides = [1, 1]} : vector<16x64xf32> to vector<16x16xf32>
    %133 = tpu.concatenate %129, %130, %131, %132 in 0 : vector<16x16xf32>, vector<16x16xf32>, vector<16x16xf32>, vector<16x16xf32> -> vector<64x16xf32>
    %134 = vector.extract_strided_slice %133 {offsets = [0, 8], sizes = [64, 8], strides = [1, 1]} : vector<64x16xf32> to vector<64x8xf32>
    %cst_61 = arith.constant 0.000000e+00 : f32
    %135 = vector.broadcast %cst_61 : f32 to vector<64x8xf32>
    %136 = arith.subf %135, %134 : vector<64x8xf32>
    %137 = vector.extract_strided_slice %133 {offsets = [0, 0], sizes = [64, 8], strides = [1, 1]} : vector<64x16xf32> to vector<64x8xf32>
    %138 = tpu.concatenate %136, %137 in 1 : vector<64x8xf32>, vector<64x8xf32> -> vector<64x16xf32>
    %139 = arith.mulf %133, %4 : vector<64x16xf32>
    %140 = arith.mulf %138, %5 : vector<64x16xf32>
    %141 = arith.addf %139, %140 : vector<64x16xf32>
    %142 = vector.extract_strided_slice %127 {offsets = [0, 64], sizes = [16, 64], strides = [1, 1]} : vector<16x192xf32> to vector<16x64xf32>
    %143 = vector.extract_strided_slice %142 {offsets = [0, 0], sizes = [16, 16], strides = [1, 1]} : vector<16x64xf32> to vector<16x16xf32>
    %144 = vector.extract_strided_slice %142 {offsets = [0, 16], sizes = [16, 16], strides = [1, 1]} : vector<16x64xf32> to vector<16x16xf32>
    %145 = vector.extract_strided_slice %142 {offsets = [0, 32], sizes = [16, 16], strides = [1, 1]} : vector<16x64xf32> to vector<16x16xf32>
    %146 = vector.extract_strided_slice %142 {offsets = [0, 48], sizes = [16, 16], strides = [1, 1]} : vector<16x64xf32> to vector<16x16xf32>
    %147 = tpu.concatenate %143, %144, %145, %146 in 0 : vector<16x16xf32>, vector<16x16xf32>, vector<16x16xf32>, vector<16x16xf32> -> vector<64x16xf32>
    %148 = vector.extract_strided_slice %147 {offsets = [0, 8], sizes = [64, 8], strides = [1, 1]} : vector<64x16xf32> to vector<64x8xf32>
    %cst_62 = arith.constant 0.000000e+00 : f32
    %149 = vector.broadcast %cst_62 : f32 to vector<64x8xf32>
    %150 = arith.subf %149, %148 : vector<64x8xf32>
    %151 = vector.extract_strided_slice %147 {offsets = [0, 0], sizes = [64, 8], strides = [1, 1]} : vector<64x16xf32> to vector<64x8xf32>
    %152 = tpu.concatenate %150, %151 in 1 : vector<64x8xf32>, vector<64x8xf32> -> vector<64x16xf32>
    %153 = arith.mulf %147, %4 : vector<64x16xf32>
    %154 = arith.mulf %152, %5 : vector<64x16xf32>
    %155 = arith.addf %153, %154 : vector<64x16xf32>
    %156 = vector.extract_strided_slice %127 {offsets = [0, 128], sizes = [16, 64], strides = [1, 1]} : vector<16x192xf32> to vector<16x64xf32>
    %157 = vector.extract_strided_slice %156 {offsets = [0, 0], sizes = [16, 16], strides = [1, 1]} : vector<16x64xf32> to vector<16x16xf32>
    %158 = vector.extract_strided_slice %156 {offsets = [0, 16], sizes = [16, 16], strides = [1, 1]} : vector<16x64xf32> to vector<16x16xf32>
    %159 = vector.extract_strided_slice %156 {offsets = [0, 32], sizes = [16, 16], strides = [1, 1]} : vector<16x64xf32> to vector<16x16xf32>
    %160 = vector.extract_strided_slice %156 {offsets = [0, 48], sizes = [16, 16], strides = [1, 1]} : vector<16x64xf32> to vector<16x16xf32>
    %161 = tpu.concatenate %157, %158, %159, %160 in 0 : vector<16x16xf32>, vector<16x16xf32>, vector<16x16xf32>, vector<16x16xf32> -> vector<64x16xf32>
    %cst_63 = arith.constant dense<0.000000e+00> : vector<64x64xf32>
    %162 = tpu.matmul %141, %155, %cst_63 {dimension_numbers = #tpu.dot_dimension_numbers<[1], [1], [0], [0], [0, 0, 1, 0], [], []>} : vector<64x16xf32>, vector<64x16xf32>, vector<64x64xf32> -> vector<64x64xf32>
    %cst_64 = arith.constant 2.500000e-01 : f32
    %163 = vector.broadcast %cst_64 : f32 to vector<64x64xf32>
    %164 = arith.mulf %162, %163 : vector<64x64xf32>
    %165 = arith.addf %164, %3 : vector<64x64xf32>
    %cst_65 = arith.constant dense<0xFF800000> : vector<64xf32>
    %166 = vector.multi_reduction <maximumf>, %165, %cst_65 [1] : vector<64x64xf32> to vector<64xf32>
    %167 = vector.shape_cast %166 : vector<64xf32> to vector<64x1xf32>
    %168 = vector.broadcast %167 : vector<64x1xf32> to vector<64x64xf32>
    %169 = arith.subf %165, %168 : vector<64x64xf32>
    %170 = math.exp %169 : vector<64x64xf32>
    %cst_66 = arith.constant dense<0.000000e+00> : vector<64xf32>
    %171 = vector.multi_reduction <add>, %170, %cst_66 [1] : vector<64x64xf32> to vector<64xf32>
    %172 = vector.shape_cast %171 : vector<64xf32> to vector<64x1xf32>
    %173 = tpu.reciprocal %172 {approx = true} : vector<64x1xf32> -> vector<64x1xf32>
    %174 = vector.broadcast %173 : vector<64x1xf32> to vector<64x64xf32>
    %175 = arith.mulf %170, %174 : vector<64x64xf32>
    %cst_67 = arith.constant dense<0.000000e+00> : vector<64x16xf32>
    %176 = tpu.matmul %175, %161, %cst_67 {dimension_numbers = #tpu.dot_dimension_numbers<[1], [0], [0], [1], [0, 0, 1, 1], [], []>} : vector<64x64xf32>, vector<64x16xf32>, vector<64x16xf32> -> vector<64x16xf32>
    %177 = vector.extract_strided_slice %176 {offsets = [0, 0], sizes = [16, 16], strides = [1, 1]} : vector<64x16xf32> to vector<16x16xf32>
    %178 = vector.extract_strided_slice %176 {offsets = [16, 0], sizes = [16, 16], strides = [1, 1]} : vector<64x16xf32> to vector<16x16xf32>
    %179 = vector.extract_strided_slice %176 {offsets = [32, 0], sizes = [16, 16], strides = [1, 1]} : vector<64x16xf32> to vector<16x16xf32>
    %180 = vector.extract_strided_slice %176 {offsets = [48, 0], sizes = [16, 16], strides = [1, 1]} : vector<64x16xf32> to vector<16x16xf32>
    %181 = tpu.concatenate %177, %178, %179, %180 in 1 : vector<16x16xf32>, vector<16x16xf32>, vector<16x16xf32>, vector<16x16xf32> -> vector<16x64xf32>
    %c0_68 = arith.constant 0 : index
    %c1_69 = arith.constant 1 : index
    %c0_70 = arith.constant 0 : index
    %c0_71 = arith.constant 0 : index
    %182 = vector.load %arg7[%c0_68, %c1_69, %c0_70, %c0_71] : memref<1x2x64x64xf32, #tpu.memory_space<vmem>>, vector<1x1x64x64xf32>
    %183 = vector.shape_cast %182 : vector<1x1x64x64xf32> to vector<64x64xf32>
    %cst_72 = arith.constant dense<0.000000e+00> : vector<16x64xf32>
    %184 = tpu.matmul %181, %183, %cst_72 {dimension_numbers = #tpu.dot_dimension_numbers<[1], [0], [0], [1], [0, 0, 1, 1], [], []>} : vector<16x64xf32>, vector<64x64xf32>, vector<16x64xf32> -> vector<16x64xf32>
    %185 = arith.addf %110, %184 : vector<16x64xf32>
    %c0_73 = arith.constant 0 : index
    %c1_74 = arith.constant 1 : index
    %c0_75 = arith.constant 0 : index
    %c0_76 = arith.constant 0 : index
    %186 = vector.load %arg8[%c0_73, %c1_74, %c0_75, %c0_76] : memref<1x2x1x64xf32, #tpu.memory_space<vmem>>, vector<1x1x1x64xf32>
    %187 = vector.shape_cast %186 : vector<1x1x1x64xf32> to vector<1x64xf32>
    %188 = arith.mulf %185, %185 : vector<16x64xf32>
    %cst_77 = arith.constant dense<0.000000e+00> : vector<16xf32>
    %189 = vector.multi_reduction <add>, %188, %cst_77 [1] : vector<16x64xf32> to vector<16xf32>
    %190 = vector.shape_cast %189 : vector<16xf32> to vector<16x1xf32>
    %cst_78 = arith.constant 6.400000e+01 : f32
    %191 = vector.broadcast %cst_78 : f32 to vector<16x1xf32>
    %192 = arith.divf %190, %191 : vector<16x1xf32>
    %cst_79 = arith.constant 9.99999974E-6 : f32
    %193 = vector.broadcast %cst_79 : f32 to vector<16x1xf32>
    %194 = arith.addf %192, %193 : vector<16x1xf32>
    %195 = math.rsqrt %194 : vector<16x1xf32>
    %196 = vector.broadcast %195 : vector<16x1xf32> to vector<16x64xf32>
    %197 = arith.mulf %185, %196 : vector<16x64xf32>
    %198 = vector.broadcast %187 : vector<1x64xf32> to vector<16x64xf32>
    %199 = arith.mulf %197, %198 : vector<16x64xf32>
    %c0_80 = arith.constant 0 : index
    %c1_81 = arith.constant 1 : index
    %c0_82 = arith.constant 0 : index
    %c0_83 = arith.constant 0 : index
    %200 = vector.load %arg9[%c0_80, %c1_81, %c0_82, %c0_83] : memref<1x2x64x256xf32, #tpu.memory_space<vmem>>, vector<1x1x64x256xf32>
    %201 = vector.shape_cast %200 : vector<1x1x64x256xf32> to vector<64x256xf32>
    %cst_84 = arith.constant dense<0.000000e+00> : vector<16x256xf32>
    %202 = tpu.matmul %199, %201, %cst_84 {dimension_numbers = #tpu.dot_dimension_numbers<[1], [0], [0], [1], [0, 0, 1, 1], [], []>} : vector<16x64xf32>, vector<64x256xf32>, vector<16x256xf32> -> vector<16x256xf32>
    %203 = vector.extract_strided_slice %202 {offsets = [0, 0], sizes = [16, 128], strides = [1, 1]} : vector<16x256xf32> to vector<16x128xf32>
    %204 = vector.extract_strided_slice %202 {offsets = [0, 128], sizes = [16, 128], strides = [1, 1]} : vector<16x256xf32> to vector<16x128xf32>
    %205 = arith.negf %203 : vector<16x128xf32>
    %206 = math.exp %205 : vector<16x128xf32>
    %cst_85 = arith.constant 1.000000e+00 : f32
    %207 = vector.broadcast %cst_85 : f32 to vector<16x128xf32>
    %208 = arith.addf %207, %206 : vector<16x128xf32>
    %209 = arith.divf %207, %208 : vector<16x128xf32>
    %210 = arith.mulf %203, %209 : vector<16x128xf32>
    %211 = arith.mulf %210, %204 : vector<16x128xf32>
    %c0_86 = arith.constant 0 : index
    %c1_87 = arith.constant 1 : index
    %c0_88 = arith.constant 0 : index
    %c0_89 = arith.constant 0 : index
    %212 = vector.load %arg10[%c0_86, %c1_87, %c0_88, %c0_89] : memref<1x2x128x64xf32, #tpu.memory_space<vmem>>, vector<1x1x128x64xf32>
    %213 = vector.shape_cast %212 : vector<1x1x128x64xf32> to vector<128x64xf32>
    %cst_90 = arith.constant dense<0.000000e+00> : vector<16x64xf32>
    %214 = tpu.matmul %211, %213, %cst_90 {dimension_numbers = #tpu.dot_dimension_numbers<[1], [0], [0], [1], [0, 0, 1, 1], [], []>} : vector<16x128xf32>, vector<128x64xf32>, vector<16x64xf32> -> vector<16x64xf32>
    %215 = arith.addf %185, %214 : vector<16x64xf32>
    %216 = vector.shape_cast %215 : vector<16x64xf32> to vector<2x8x64xf32>
    %217 = vector.extract_strided_slice %216 {offsets = [0, 0, 0], sizes = [2, 1, 64], strides = [1, 1, 1]} : vector<2x8x64xf32> to vector<2x1x64xf32>
    %218 = vector.shape_cast %217 : vector<2x1x64xf32> to vector<2x64xf32>
    %219 = arith.mulf %218, %218 : vector<2x64xf32>
    %cst_91 = arith.constant dense<0.000000e+00> : vector<2xf32>
    %220 = vector.multi_reduction <add>, %219, %cst_91 [1] : vector<2x64xf32> to vector<2xf32>
    %221 = vector.shape_cast %220 : vector<2xf32> to vector<2x1xf32>
    %cst_92 = arith.constant 6.400000e+01 : f32
    %222 = vector.broadcast %cst_92 : f32 to vector<2x1xf32>
    %223 = arith.divf %221, %222 : vector<2x1xf32>
    %cst_93 = arith.constant 9.99999974E-6 : f32
    %224 = vector.broadcast %cst_93 : f32 to vector<2x1xf32>
    %225 = arith.addf %223, %224 : vector<2x1xf32>
    %226 = math.rsqrt %225 : vector<2x1xf32>
    %227 = vector.broadcast %226 : vector<2x1xf32> to vector<2x64xf32>
    %228 = arith.mulf %218, %227 : vector<2x64xf32>
    %c0_94 = arith.constant 0 : index
    %c0_95 = arith.constant 0 : index
    %c0_96 = arith.constant 0 : index
    %229 = vector.load %arg11[%c0_94, %c0_95, %c0_96] : memref<1x1x64xf32, #tpu.memory_space<vmem>>, vector<1x1x64xf32>
    %230 = vector.shape_cast %229 : vector<1x1x64xf32> to vector<1x64xf32>
    %231 = vector.broadcast %230 : vector<1x64xf32> to vector<2x64xf32>
    %232 = arith.mulf %228, %231 : vector<2x64xf32>
    %c0_97 = arith.constant 0 : index
    %c0_98 = arith.constant 0 : index
    %c0_99 = arith.constant 0 : index
    %233 = vector.load %arg12[%c0_97, %c0_98, %c0_99] : memref<1x2x64xf32, #tpu.memory_space<vmem>>, vector<1x2x64xf32>
    %234 = vector.shape_cast %233 : vector<1x2x64xf32> to vector<2x64xf32>
    %235 = vector.shape_cast %232 : vector<2x64xf32> to vector<1x2x64xf32>
    tpu.vector_store %arg12[%c0_97, %c0_98, %c0_99], %235 {strides = array<i32>} : memref<1x2x64xf32, #tpu.memory_space<vmem>>, vector<1x2x64xf32>,
    return
  }
  func.func @transform_0(%arg0: i32) -> (i32, i32, i32) {
    %c0_i32 = arith.constant 0 : i32
    %c0_i32_0 = arith.constant 0 : i32
    %c0_i32_1 = arith.constant 0 : i32
    return %arg0, %c0_i32, %c0_i32_0 : i32, i32, i32
  }
  func.func @transform_1(%arg0: i32) -> (i32, i32, i32) {
    %c0_i32 = arith.constant 0 : i32
    %c0_i32_0 = arith.constant 0 : i32
    %c0_i32_1 = arith.constant 0 : i32
    return %arg0, %c0_i32, %c0_i32_0 : i32, i32, i32
  }
  func.func @transform_2(%arg0: i32) -> (i32, i32) {
    %c0_i32 = arith.constant 0 : i32
    %c0_i32_0 = arith.constant 0 : i32
    %c0_i32_1 = arith.constant 0 : i32
    return %c0_i32, %c0_i32_0 : i32, i32
  }
  func.func @transform_3(%arg0: i32) -> (i32, i32) {
    %c0_i32 = arith.constant 0 : i32
    %c0_i32_0 = arith.constant 0 : i32
    %c0_i32_1 = arith.constant 0 : i32
    return %c0_i32, %c0_i32_0 : i32, i32
  }
  func.func @transform_4(%arg0: i32) -> (i32, i32, i32, i32) {
    %c0_i32 = arith.constant 0 : i32
    %c0_i32_0 = arith.constant 0 : i32
    %c0_i32_1 = arith.constant 0 : i32
    %c0_i32_2 = arith.constant 0 : i32
    return %arg0, %c0_i32, %c0_i32_0, %c0_i32_1 : i32, i32, i32, i32
  }
  func.func @transform_5(%arg0: i32) -> (i32, i32, i32, i32) {
    %c0_i32 = arith.constant 0 : i32
    %c0_i32_0 = arith.constant 0 : i32
    %c0_i32_1 = arith.constant 0 : i32
    %c0_i32_2 = arith.constant 0 : i32
    return %arg0, %c0_i32, %c0_i32_0, %c0_i32_1 : i32, i32, i32, i32
  }
  func.func @transform_6(%arg0: i32) -> (i32, i32, i32, i32) {
    %c0_i32 = arith.constant 0 : i32
    %c0_i32_0 = arith.constant 0 : i32
    %c0_i32_1 = arith.constant 0 : i32
    %c0_i32_2 = arith.constant 0 : i32
    return %arg0, %c0_i32, %c0_i32_0, %c0_i32_1 : i32, i32, i32, i32
  }
  func.func @transform_7(%arg0: i32) -> (i32, i32, i32, i32) {
    %c0_i32 = arith.constant 0 : i32
    %c0_i32_0 = arith.constant 0 : i32
    %c0_i32_1 = arith.constant 0 : i32
    %c0_i32_2 = arith.constant 0 : i32
    return %arg0, %c0_i32, %c0_i32_0, %c0_i32_1 : i32, i32, i32, i32
  }
  func.func @transform_8(%arg0: i32) -> (i32, i32, i32, i32) {
    %c0_i32 = arith.constant 0 : i32
    %c0_i32_0 = arith.constant 0 : i32
    %c0_i32_1 = arith.constant 0 : i32
    %c0_i32_2 = arith.constant 0 : i32
    return %arg0, %c0_i32, %c0_i32_0, %c0_i32_1 : i32, i32, i32, i32
  }
  func.func @transform_9(%arg0: i32) -> (i32, i32, i32, i32) {
    %c0_i32 = arith.constant 0 : i32
    %c0_i32_0 = arith.constant 0 : i32
    %c0_i32_1 = arith.constant 0 : i32
    %c0_i32_2 = arith.constant 0 : i32
    return %arg0, %c0_i32, %c0_i32_0, %c0_i32_1 : i32, i32, i32, i32
  }
  func.func @transform_10(%arg0: i32) -> (i32, i32, i32) {
    %c0_i32 = arith.constant 0 : i32
    %c0_i32_0 = arith.constant 0 : i32
    %c0_i32_1 = arith.constant 0 : i32
    return %arg0, %c0_i32, %c0_i32_0 : i32, i32, i32
  }
  func.func @transform_11(%arg0: i32) -> (i32, i32, i32) {
    %c0_i32 = arith.constant 0 : i32
    %c0_i32_0 = arith.constant 0 : i32
    %c0_i32_1 = arith.constant 0 : i32
    return %arg0, %c0_i32, %c0_i32_0 : i32, i32, i32
  }
}

</mosaic_0001>

<bundles_post_ra>
// kernel: dense_encoder_forward.1
= control target key start
LH: loop header
LB: loop body
LE: loop exit
PB: predicated region body
PF: predicated region fallthrough
CT: control target
= control target key end

     0   :  { %s2996_s17 = smov 0   ;;  %s4042_s0 = inlined_call_operand.vmem [shape: f32[2,16,64], index: 0, kind: input, shape index: {}]   ;;  %s4043_s1 = inlined_call_operand.vmem [shape: f32[2,64,64], index: 1, kind: input, shape index: {}]   ;;  %s4044_s2 = inlined_call_operand.vmem [shape: f32[64,16], index: 2, kind: input, shape index: {}]   ;;  %s4045_s3 = inlined_call_operand.vmem [shape: f32[64,16], index: 3, kind: input, shape index: {}]   ;;  %s4046_s4 = inlined_call_operand.vmem [shape: f32[2,2,1,64], index: 4, kind: input, shape index: {}]   ;;  %s4047_s5 = inlined_call_operand.vmem [shape: f32[2,2,64,192], index: 5, kind: input, shape index: {}]   ;;  %s4048_s6 = inlined_call_operand.vmem [shape: f32[2,2,64,64], index: 6, kind: input, shape index: {}]   ;;  %s4049_s7 = inlined_call_operand.vmem [shape: f32[2,2,1,64], index: 7, kind: input, shape index: {}]   ;;  %s4050_s8 = inlined_call_operand.vmem [shape: f32[2,2,64,256], index: 8, kind: input, shape index: {}]   ;;  %s4051_s9 = inlined_call_operand.vmem [shape: f32[2,2,128,64], index: 9, kind: input, shape index: {}]   ;;  %s4052_s10 = inlined_call_operand.vmem [shape: f32[2,1,64], index: 10, kind: input, shape index: {}]   ;;  %s4053_s11 = inlined_call_operand.vmem [shape: f32[2,2,64], index: 11, kind: output, shape index: {}]  }
   0x1 LB: > { %s2577_s18 = sadd.s32 4294967295, %s2922_s17   ;;  %p2581_p0 = scmp.ge.s32.totalorder %s2922_s17, 1  ;;  %s2922_s17 = sphi %s2996_s17, %s21_s17  }
   0x2   : > { %p413_p1 = scmp.lt.s32.totalorder %s2922_s17, 3 }
   0x4   : > { %p414_p2 = pnand %p2581_p0, %p413_p1 }
   0x5   : > { %p488_p3 = scmp.lt.s32.totalorder (!%p414_p2), %s2577_s18, 1  ;;  %s2925_s12 = smov (!%p414_p2), 112  }
   0x6   : > { %417 = sbr.rel (%p414_p2) target bundleno = 4335 (0x10ef), region = 64  ;;  %s2926_s13 = smov (!%p414_p2), 96  }
   0x7   : > { %s2927_s14 = smov (!%p414_p2), 80   ;;  %s2928_s15 = smov (!%p414_p2), 72  }
   0x8   : > { %s4060_s16 = smov (!%p414_p2), 56   ;;  %s4058_s21 = smov (!%p414_p2), 64  }
   0x9   : > { %s4054_s24 = smov (!%p414_p2), 120   ;;  %s4056_s25 = smov (!%p414_p2), 8  }
   0xa   : > { %s4064_s29 = smov (!%p414_p2), 32  }
   0xb   : > { %s4076_s18 = smov (!%p488_p3, %s2577_s18), 1  ;;  %vm562_vm0 = vcmask 523264   ;;  %v2924_v6 = vmov 64.0   ;;  %vm759_vm8 = vcmask 64512   ;;  %vm980_vm9 = vcmask 130048  }
   0xc   : > { %s2729_s19 = sshll.u32 %s4076_s18, 4  ;;  %s3025_s23 = sshll.u32 %s4076_s18, 1  ;;  %2790 = vrcp.f32 %v2924_v6  ;;  %vm1257_vm10 = vcmask 261120   ;;  %vm1260_vm11 = vcmask 392192  }
   0xd   : > { %s3010_s22 = scalar_lea.vmem %s4042_s0, %s2729_s19  ;;  %s3031_s26 = scalar_lea.vmem %s4046_s4, %s3025_s23 }
   0xe   : > { %v3013_v0 = vld [vmem:[%s3010_s22] sm:$0xff]  ;;  %v3018_v2 = vld [vmem:[%s3010_s22 + $0x8] sm:$0xff]  ;;  %s3034_s27 = sshll.u32 %s4076_s18, 8  ;;  %s2730_s28 = sshll.u32 %s4076_s18, 6 }
   0xf   : > { %v560_v1 = vmul.f32 %v3013_v0, %v3013_v0  ;;  %v561_v4 = vmul.f32 %v3018_v2, %v3018_v2  ;;  %s3040_s30 = scalar_lea.vmem %s4047_s5, %s3034_s27  ;;  %v2785_v43 = vld [vmem:[%s3031_s26] ss:$0 sm:$0xff]  ;;  %s3397_s20 = scalar_lea.vmem %s4043_s1, %s2730_s28 }
  0x10   : > { %v621_v8 = vld [vmem:[%s3040_s30 + $0x70] sm:$0xff]  ;;  %v622_v9 = vld [vmem:[%s3040_s30 + $0x78] sm:$0xff]  ;;  %v619_v10 = vld [vmem:[%s3040_s30 + $0x60] sm:$0xff]  ;;  %s4066_s28 = smov 16   ;;  %s4062_s19 = smov 48  }
  0x11   : > { %v563_v3 = vsel %vm562_vm0, %v560_v1, 0.0  ;;  %v566_v5 = vsel %vm562_vm0, %v561_v4, 0.0  ;;  %637 = vmatpush.msra.mxu0 %v621_v8  ;;  %660 = vmatpush.msra.mxu1 %v622_v9  ;;  %v620_v11 = vld [vmem:[%s3040_s30 + $0x68] sm:$0xff]  ;;  %v617_v13 = vld [vmem:[%s3040_s30 + $0x50] sm:$0xff]  ;;  %v618_v14 = vld [vmem:[%s3040_s30 + $0x58] sm:$0xff] }
  0x12   : > { %564 = vadd.xlane.f32.xlu0 %v563_v3  ;;  %v2791_v7 = vpop.eup %2790  ;;  %v615_v15 = vld [vmem:[%s3040_s30 + $0x40] sm:$0xff]  ;;  %v616_v16 = vld [vmem:[%s3040_s30 + $0x48] sm:$0xff]  ;;  %v613_v18 = vld [vmem:[%s3040_s30 + $0x30] sm:$0xff] }
  0x13   : > { %v570_v12 = vmul.f32 64.0, %v2791_v7  ;;  %638 = vmatpush.msra.mxu0 %v619_v10  ;;  %661 = vmatpush.msra.mxu1 %v620_v11  ;;  %v614_v19 = vld [vmem:[%s3040_s30 + $0x38] sm:$0xff]  ;;  %v611_v20 = vld [vmem:[%s3040_s30 + $0x20] sm:$0xff]  ;;  %v612_v21 = vld [vmem:[%s3040_s30 + $0x28] sm:$0xff]  ;;  %vm574_vm1 = vweird.f32 %v2791_v7 }
  0x14   : > { %v609_v23 = vld [vmem:[%s3040_s30 + $0x10] sm:$0xff]  ;;  %v610_v24 = vld [vmem:[%s3040_s30 + $0x18] sm:$0xff]  ;;  %v607_v25 = vld [vmem:[%s3040_s30] sm:$0xff] }
  0x15   : > { %639 = vmatpush.msra.mxu0 %v617_v13  ;;  %662 = vmatpush.msra.mxu1 %v618_v14  ;;  %v571_v17 = vsub.f32 1.0, %v570_v12  ;;  %v608_v26 = vld [vmem:[%s3040_s30 + $0x8] sm:$0xff]  ;;  %v3162_v8 = vld [vmem:[%s4044_s2 + $0x38] sm:$0xff]  ;;  %v3169_v9 = vld [vmem:[%s4044_s2 + $0x20] sm:$0xff] }
  0x16   : > { %v3130_v3 = vld [vmem:[%s4044_s2 + $0x28] sm:$0xff]  ;;  %v3176_v13 = vld [vmem:[%s4045_s3 + $0x30] sm:$0xff] }
  0x17   : > { %640 = vmatpush.msra.mxu0 %v615_v15  ;;  %663 = vmatpush.msra.mxu1 %v616_v16  ;;  %v572_v22 = vmul.f32 %v2791_v7, %v571_v17  ;;  %v3182_v17 = vld [vmem:[%s4045_s3 + $0x28] sm:$0xff] }
  0x19   : > { %641 = vmatpush.msra.mxu0 %v613_v18  ;;  %664 = vmatpush.msra.mxu1 %v614_v19  ;;  %v573_v27 = vadd.f32 %v2791_v7, %v572_v22  ;;  %v3192_v22 = vld [vmem:[%s4045_s3 + $0x38] sm:$0xff] }
  0x1a   : > { %567 = vadd.xlane.f32.xlu0 %v566_v5 }
  0x1b   : > { %642 = vmatpush.msra.mxu0 %v611_v20  ;;  %665 = vmatpush.msra.mxu1 %v612_v21  ;;  %v3058_v28 = vsel %vm574_vm1, %v2791_v7, %v573_v27  ;;  %v3155_v7 = vld [vmem:[%s4044_s2 + $0x30] sm:$0xff]  ;;  %v3200_v27 = vld [vmem:[%s4044_s2 + $0x18] sm:$0xff] }
  0x1d   : > { %643 = vmatpush.msra.mxu0 %v609_v23  ;;  %666 = vmatpush.msra.mxu1 %v610_v24 }
  0x1f   : > { %644 = vmatpush.msra.mxu0 %v607_v25  ;;  %667 = vmatpush.msra.mxu1 %v608_v26 }
  0x85   : > { %v565_v29 = vpop.xlane.xlu0 %564 }
  0x86   : > { %v576_v30 = vmul.f32 %v3058_v28, %v565_v29 }
  0x88   : > { %v578_v31 = vadd.f32 1e-05, %v576_v30  ;;  %v3207_v30 = vld [vmem:[%s4045_s3 + $0x20] sm:$0xff] }
  0x8a   : > { %2792 = vrsqrt.f32 %v578_v31  ;;  %vm586_vm3 = vweird.f32 %v578_v31 }
  0x8d   : > { %v568_v32 = vpop.xlane.xlu0 %567 }
  0x8e   : > { %v577_v33 = vmul.f32 %v3058_v28, %v568_v32 }
  0x90   : > { %v2793_v34 = vpop.eup %2792  ;;  %v579_v35 = vadd.f32 1e-05, %v577_v33  ;;  %v3212_v33 = vld [vmem:[%s4045_s3 + $0x10] sm:$0xff] }
  0x91   : > { %v581_v36 = vmul.f32 %v2793_v34, %v578_v31  ;;  %vm587_vm2 = vweird.f32 %v2793_v34 }
  0x92   : > { %2794 = vrsqrt.f32 %v579_v35  ;;  %vm588_vm4 = vmor %vm586_vm3, %vm587_vm2  ;;  %vm596_vm6 = vweird.f32 %v579_v35 }
  0x93   : > { %v582_v37 = vmul.f32 %v2793_v34, %v581_v36 }
  0x95   : > { %v583_v38 = vmul.f32 0.5, %v582_v37 }
  0x97   : > { %v584_v39 = vsub.f32 1.5, %v583_v38  ;;  %v3223_v38 = vld [vmem:[%s4045_s3 + $0x18] sm:$0xff] }
  0x98   : > { %v2795_v40 = vpop.eup %2794 }
  0x99   : > { %v591_v41 = vmul.f32 %v2795_v40, %v579_v35  ;;  %v585_v42 = vmul.f32 %v2793_v34, %v584_v39  ;;  %vm597_vm5 = vweird.f32 %v2795_v40 }
  0x9a   : > { %vm598_vm7 = vmor %vm596_vm6, %vm597_vm5 }
  0x9b   : > { %v592_v44 = vmul.f32 %v2795_v40, %v591_v41  ;;  %v589_v45 = vsel %vm588_vm4, %v2793_v34, %v585_v42  ;;  %v3230_v42 = vld [vmem:[%s4044_s2 + $0x10] sm:$0xff] }
  0x9c   : > { %v600_v46 = vmul.f32 %v589_v45, %v3013_v0 }
  0x9d   : > { %v593_v47 = vmul.f32 0.5, %v592_v44  ;;  %v3245_v44 = vld [vmem:[%s4045_s3 + $0x8] sm:$0xff] }
  0x9e   : > { %v605_v48 = vmul.f32 %v2785_v43, %v600_v46 }
  0x9f   : > { %v594_v49 = vsub.f32 1.5, %v593_v47 }
  0xa0   : > { %2597 = vmatmul.msk.f32.vlgmr.msra.gmra.mxu0 %vm562_vm0, %v605_v48  ;;  %2599 = vmatmul.msk.f32.vlgmr.msra.gmra.mxu1 %vm562_vm0, %v605_v48 }
  0xa1   : > { %v595_v50 = vmul.f32 %v2795_v40, %v594_v49  ;;  %v3252_v49 = vld [vmem:[%s4044_s2 + $0x8] sm:$0xff] }
  0xa3   : > { %v599_v51 = vsel %vm598_vm7, %v2795_v40, %v595_v50  ;;  %v3260_v50 = vld [vmem:[%s4045_s3] sm:$0xff] }
  0xa4   : > { %v601_v52 = vmul.f32 %v599_v51, %v3018_v2 }
  0xa6   : > { %v606_v53 = vmul.f32 %v2785_v43, %v601_v52  ;;  %v3238_v43 = vld [vmem:[%s4044_s2] sm:$0xff] }
  0xa8   : > { %2598 = vmatmul.msk.f32.gmra.mxu0 %vm562_vm0, %v606_v53  ;;  %2600 = vmatmul.msk.f32.gmra.mxu1 %vm562_vm0, %v606_v53 }
 0x11d   : > { %v3069_v54 = vpop.f32.mrf.mxu0 }
 0x11e   : > { %v695_v1 = vsub.f32 0.0, %v3069_v54 }
 0x125   : > { %v3071_v55 = vpop.f32.mrf.mxu0 }
 0x126   : > { %679 = vrot.lane.b32.xlu0 %v3071_v55, %s2925_s12  ;;  %685 = vrot.lane.b32.xlu2 %v3071_v55, %s2926_s13  ;;  %v696_v5 = vsub.f32 0.0, %v3071_v55 }
 0x127   : > { %691 = vrot.lane.b32.xlu1 %v3071_v55, %s2927_s14 }
 0x12e   : > { %683 = vrot.lane.b32.xlu2 %v3069_v54, %s2926_s13 }
 0x12f   : > { %689 = vrot.lane.b32.xlu1 %v3069_v54, %s2927_s14 }
 0x137   : > { %677 = vrot.lane.b32.xlu1 %v3069_v54, %s2925_s12 }
 0x180   : > { %v3085_v56 = vpop.permute.xlu2 %685 }
 0x181   : > { %826 = vrot.lane.b32.xlu0 %v3085_v56, %s2928_s15  ;;  %v700_v4 = vsub.f32 0.0, %v3085_v56 }
 0x188   : > { %v3111_v63 = vpop.permute.xlu2 %683 }
 0x189   : > { %v699_v0 = vsub.f32 0.0, %v3111_v63 }
 0x198   : > { %v3089_v57 = vpop.permute.xlu0 %679 }
 0x199   : > { %v3091_v58 = vpop.permute.xlu1 %691  ;;  %v698_v59 = vsub.f32 0.0, %v3089_v57 }
 0x19a   : > { %v702_v2 = vsub.f32 0.0, %v3091_v58 }
 0x19b   : > { %798 = vrot.lane.b32.xlu0 %v698_v59, %s4060_s16 }
 0x1a1   : > { %v3097_v60 = vpop.permute.xlu1 %689 }
 0x1a2   : > { %828 = vrot.lane.b32.xlu1 %v3097_v60, %s2928_s15  ;;  %v701_v61 = vsub.f32 0.0, %v3097_v60 }
 0x1a4   : > { %804 = vrot.lane.b32.xlu2 %v701_v61, %s4060_s16 }
 0x1a9   : > { %v3105_v62 = vpop.permute.xlu1 %677 }
 0x1aa   : > { %830 = vrot.lane.b32.xlu1 %v3091_v58, %s2928_s15  ;;  %820 = vrot.lane.b32.xlu0 %v3105_v62, %s2928_s15  ;;  %v697_v6 = vsub.f32 0.0, %v3105_v62 }
 0x1ac   : > { %824 = vrot.lane.b32.xlu2 %v3111_v63, %s2928_s15 }
 0x1b2   : > { %800 = vrot.lane.b32.xlu1 %v699_v0, %s4060_s16  ;;  %792 = vrot.lane.b32.xlu0 %v695_v1, %s4060_s16 }
 0x1b4   : > { %806 = vrot.lane.b32.xlu2 %v702_v2, %s4060_s16 }
 0x1ba   : > { %822 = vrot.lane.b32.xlu1 %v3089_v57, %s2928_s15  ;;  %866 = vrot.lane.b32.xlu0 %v3130_v3, %s4058_s21 }
 0x1bc   : > { %802 = vrot.lane.b32.xlu2 %v700_v4, %s4060_s16 }
 0x1c2   : > { %794 = vrot.lane.b32.xlu1 %v696_v5, %s4060_s16 }
 0x1c4   : > { %796 = vrot.lane.b32.xlu2 %v697_v6, %s4060_s16 }
 0x1ca   : > { %816 = vrot.lane.b32.xlu1 %v3069_v54, %s2928_s15 }
 0x1cc   : > { %818 = vrot.lane.b32.xlu2 %v3071_v55, %s2928_s15 }
 0x1d2   : > { %868 = vrot.lane.b32.xlu1 %v3155_v7, %s4058_s21 }
 0x1d4   : > { %870 = vrot.lane.b32.xlu2 %v3162_v8, %s4058_s21 }
 0x1dc   : > { %864 = vrot.lane.b32.xlu2 %v3169_v9, %s4058_s21 }
 0x1f3   : > { %v827_v14 = vpop.permute.xlu0 %826 }
 0x1fe   : > { %v805_v10 = vpop.permute.xlu2 %804 }
 0x206   : > { %v825_v11 = vpop.permute.xlu2 %824 }
 0x20d   : > { %v799_v23 = vpop.permute.xlu0 %798 }
 0x20e   : > { %v807_v12 = vpop.permute.xlu2 %806 }
 0x214   : > { %v829_v15 = vpop.permute.xlu1 %828 }
 0x215   : > { %v846_v16 = vsel %vm759_vm8, %v805_v10, %v829_v15 }
 0x216   : > { %v894_v18 = vmul.f32 %v846_v16, %v3176_v13  ;;  %v803_v19 = vpop.permute.xlu2 %802 }
 0x217   : > { %v845_v20 = vsel %vm759_vm8, %v803_v19, %v827_v14 }
 0x218   : > { %v893_v21 = vmul.f32 %v845_v20, %v3182_v17  ;;  %916 = vrot.lane.b32.xlu2 %v894_v18, %s4058_s21 }
 0x21a   : > { %914 = vrot.lane.b32.xlu1 %v893_v21, %s4058_s21 }
 0x21c   : > { %v831_v24 = vpop.permute.xlu1 %830  ;;  %v821_v31 = vpop.permute.xlu0 %820 }
 0x21d   : > { %v847_v25 = vsel %vm759_vm8, %v807_v12, %v831_v24 }
 0x21e   : > { %v895_v26 = vmul.f32 %v847_v25, %v3192_v22  ;;  %v797_v29 = vpop.permute.xlu2 %796 }
 0x21f   : > { %v842_v34 = vsel %vm759_vm8, %v797_v29, %v821_v31 }
 0x220   : > { %918 = vrot.lane.b32.xlu0 %v895_v26, %s4058_s21  ;;  %v890_v37 = vmul.f32 %v842_v34, %v3212_v33 }
 0x222   : > { %862 = vrot.lane.b32.xlu1 %v3200_v27, %s4058_s21 }
 0x224   : > { %v801_v32 = vpop.permute.xlu1 %800  ;;  %v793_v51 = vpop.permute.xlu0 %792 }
 0x225   : > { %v844_v35 = vsel %vm759_vm8, %v801_v32, %v825_v11 }
 0x226   : > { %v892_v36 = vmul.f32 %v844_v35, %v3207_v30  ;;  %v819_v45 = vpop.permute.xlu2 %818 }
 0x228   : > { %912 = vrot.lane.b32.xlu0 %v892_v36, %s4058_s21 }
 0x22a   : > { %908 = vrot.lane.b32.xlu1 %v890_v37, %s4058_s21 }
 0x22c   : > { %v823_v39 = vpop.permute.xlu1 %822  ;;  %v3274_v19 = vpop.permute.xlu0 %866 }
 0x22d   : > { %v843_v40 = vsel %vm759_vm8, %v799_v23, %v823_v39  ;;  %v885_v20 = vmul.f32 %v3274_v19, %v3085_v56 }
 0x22e   : > { %v891_v41 = vmul.f32 %v843_v40, %v3223_v38  ;;  %v3265_v11 = vpop.permute.xlu2 %870 }
 0x22f   : > { %v887_v24 = vmul.f32 %v3265_v11, %v3091_v58 }
 0x230   : > { %860 = vrot.lane.b32.xlu0 %v3230_v42, %s4058_s21  ;;  %910 = vrot.lane.b32.xlu2 %v891_v41, %s4058_s21 }
 0x232   : > { %856 = vrot.lane.b32.xlu1 %v3238_v43, %s4058_s21 }
 0x234   : > { %v795_v46 = vpop.permute.xlu1 %794 }
 0x235   : > { %v841_v47 = vsel %vm759_vm8, %v795_v46, %v819_v45 }
 0x236   : > { %v889_v48 = vmul.f32 %v841_v47, %v3245_v44  ;;  %v3267_v12 = vpop.permute.xlu2 %864 }
 0x237   : > { %v884_v35 = vmul.f32 %v3267_v12, %v3111_v63 }
 0x238   : > { %858 = vrot.lane.b32.xlu2 %v3252_v49, %s4058_s21  ;;  %906 = vrot.lane.b32.xlu0 %v889_v48, %s4058_s21 }
 0x23c   : > { %v817_v52 = vpop.permute.xlu1 %816 }
 0x23d   : > { %v840_v53 = vsel %vm759_vm8, %v793_v51, %v817_v52 }
 0x23e   : > { %v888_v10 = vmul.f32 %v840_v53, %v3260_v50 }
 0x240   : > { %904 = vrot.lane.b32.xlu2 %v888_v10, %s4058_s21 }
 0x244   : > { %v3269_v14 = vpop.permute.xlu1 %868 }
 0x245   : > { %v886_v15 = vmul.f32 %v3269_v14, %v3097_v60 }
 0x272   : > { %v917_v16 = vpop.permute.xlu2 %916 }
 0x273   : > { %v934_v18 = vadd.f32 %v917_v16, %v886_v15 }
 0x275   : > { %976 = vrot.lane.b32.xlu1 %v934_v18, %s4058_s21 }
 0x28a   : > { %v911_v32 = vpop.permute.xlu2 %910 }
 0x28c   : > { %v915_v21 = vpop.permute.xlu1 %914 }
 0x28d   : > { %v933_v23 = vadd.f32 %v915_v21, %v885_v20  ;;  %v768_v21 = vmul.f32 %v3069_v54, %v3238_v43 }
 0x28f   : > { %974 = vrot.lane.b32.xlu2 %v933_v23, %s4058_s21 }
 0x292   : > { %v919_v25 = vpop.permute.xlu0 %918  ;;  %v3297_v46 = vpop.permute.xlu2 %858 }
 0x293   : > { %v935_v26 = vadd.f32 %v919_v25, %v887_v24  ;;  %v881_v47 = vmul.f32 %v3297_v46, %v3071_v55 }
 0x294   : > { %v3281_v29 = vpop.permute.xlu1 %862 }
 0x295   : > { %v883_v31 = vmul.f32 %v3281_v29, %v3089_v57  ;;  %978 = vrot.lane.b32.xlu0 %v935_v26, %s4058_s21 }
 0x297   : > { %v931_v34 = vadd.f32 %v911_v32, %v883_v31 }
 0x299   : > { %970 = vrot.lane.b32.xlu1 %v931_v34, %s4058_s21  ;;  %v769_v34 = vmul.f32 %v3071_v55, %v3252_v49  ;;  %v771_v49 = vmul.f32 %v3089_v57, %v3200_v27  ;;  %v773_v27 = vmul.f32 %v3085_v56, %v3130_v3  ;;  %v775_v3 = vmul.f32 %v3091_v58, %v3162_v8  ;;  %v536_v8 = vld [vmem:[%s3397_s20 + $0x8] sm:$0xff] }
 0x29a   : > { %v913_v36 = vpop.permute.xlu0 %912  ;;  %v905_v53 = vpop.permute.xlu2 %904 }
 0x29b   : > { %v932_v37 = vadd.f32 %v913_v36, %v884_v35 }
 0x29c   : > { %v909_v39 = vpop.permute.xlu1 %908 }
 0x29d   : > { %972 = vrot.lane.b32.xlu0 %v932_v37, %s4058_s21  ;;  %v770_v37 = vmul.f32 %v3105_v62, %v3230_v42 }
 0x2a1   : > { %711 = vrot.lane.b32.xlu1 %v695_v1, %s4054_s24 }
 0x2a2   : > { %v3293_v40 = vpop.permute.xlu0 %860 }
 0x2a3   : > { %v882_v41 = vmul.f32 %v3293_v40, %v3105_v62 }
 0x2a4   : > { %v3305_v51 = vpop.permute.xlu1 %856 }
 0x2a5   : > { %v930_v45 = vadd.f32 %v909_v39, %v882_v41  ;;  %v880_v52 = vmul.f32 %v3305_v51, %v3069_v54 }
 0x2a7   : > { %968 = vrot.lane.b32.xlu2 %v930_v45, %s4058_s21  ;;  %v928_v10 = vadd.f32 %v905_v53, %v880_v52  ;;  %v772_v52 = vmul.f32 %v3111_v63, %v3169_v9  ;;  %v774_v9 = vmul.f32 %v3097_v60, %v3155_v7  ;;  %v535_v7 = vld [vmem:[%s3397_s20] sm:$0xff] }
 0x2a9   : > { %713 = vrot.lane.b32.xlu1 %v696_v5, %s4054_s24 }
 0x2aa   : > { %v907_v48 = vpop.permute.xlu0 %906 }
 0x2ab   : > { %v929_v1 = vadd.f32 %v907_v48, %v881_v47 }
 0x2ad   : > { %966 = vrot.lane.b32.xlu0 %v929_v1, %s4058_s21 }
 0x2af   : > { %735 = vrot.lane.b32.xlu2 %v3069_v54, %s4056_s25 }
 0x2b1   : > { %739 = vrot.lane.b32.xlu1 %v3105_v62, %s4056_s25 }
 0x2b5   : > { %964 = vrot.lane.b32.xlu0 %v928_v10, %s4058_s21  ;;  %s4069_s21 = smov 64  }
 0x2b7   : > { %737 = vrot.lane.b32.xlu2 %v3071_v55, %s4056_s25 }
 0x2b9   : > { %719 = vrot.lane.b32.xlu1 %v699_v0, %s4054_s24 }
 0x2bd   : > { %715 = vrot.lane.b32.xlu0 %v697_v6, %s4054_s24 }
 0x2bf   : > { %717 = vrot.lane.b32.xlu2 %v698_v59, %s4054_s24 }
 0x2c1   : > { %745 = vrot.lane.b32.xlu1 %v3085_v56, %s4056_s25 }
 0x2c5   : > { %741 = vrot.lane.b32.xlu0 %v3089_v57, %s4056_s25 }
 0x2c7   : > { %743 = vrot.lane.b32.xlu2 %v3111_v63, %s4056_s25 }
 0x2c9   : > { %725 = vrot.lane.b32.xlu1 %v702_v2, %s4054_s24 }
 0x2cd   : > { %721 = vrot.lane.b32.xlu0 %v700_v4, %s4054_s24 }
 0x2cf   : > { %723 = vrot.lane.b32.xlu2 %v701_v61, %s4054_s24  ;;  %s2732_s24 = sshll.u32 %s4076_s18, 7 }
 0x2d0   : > { %s3484_s16 = scalar_lea.vmem %s4048_s6, %s2732_s24  ;;  %s4070_s24 = smov 8  }
 0x2d5   : > { %747 = vrot.lane.b32.xlu0 %v3097_v60, %s4056_s25 }
 0x2d7   : > { %749 = vrot.lane.b32.xlu2 %v3091_v58, %s4056_s25  ;;  %s3518_s25 = scalar_lea.vmem %s4049_s7, %s3025_s23 }
 0x2e7   : > { %v977_v0 = vpop.permute.xlu1 %976 }
 0x2e9   : > { %v975_v2 = vpop.permute.xlu2 %974 }
 0x301   : > { %v969_v61 = vpop.permute.xlu2 %968 }
 0x307   : > { %v979_v59 = vpop.permute.xlu0 %978 }
 0x308   : > { %2601 = vmatpush.xpose.msk.msra.mxu2 %vm980_vm9, %v979_v59 }
 0x309   : > { %v736_v15 = vpop.permute.xlu2 %735 }
 0x30b   : > { %v971_v4 = vpop.permute.xlu1 %970 }
 0x30c   : > { %2602 = vmatpush.xpose.msk.msra.mxu2 %vm980_vm9, %v977_v0 }
 0x30f   : > { %v973_v5 = vpop.permute.xlu0 %972 }
 0x310   : > { %2603 = vmatpush.xpose.msk.msra.mxu2 %vm980_vm9, %v975_v2 }
 0x311   : > { %v738_v25 = vpop.permute.xlu2 %737 }
 0x313   : > { %v712_v6 = vpop.permute.xlu1 %711 }
 0x314   : > { %2604 = vmatpush.xpose.msk.msra.mxu2 %vm980_vm9, %v973_v5  ;;  %v760_v18 = vsel %vm759_vm8, %v712_v6, %v736_v15 }
 0x315   : > { %v776_v20 = vmul.f32 %v760_v18, %v3260_v50 }
 0x317   : > { %v784_v26 = vadd.f32 %v776_v20, %v768_v21 }
 0x318   : > { %2605 = vmatpush.xpose.msk.msra.mxu2 %vm980_vm9, %v971_v4 }
 0x319   : > { %v718_v39 = vpop.permute.xlu2 %717 }
 0x31b   : > { %v714_v23 = vpop.permute.xlu1 %713 }
 0x31c   : > { %2606 = vmatpush.xpose.msk.msra.mxu2 %vm980_vm9, %v969_v61  ;;  %v761_v31 = vsel %vm759_vm8, %v714_v23, %v738_v25  ;;  %v537_v23 = vld [vmem:[%s3397_s20 + $0x10] sm:$0xff] }
 0x31d   : > { %v777_v32 = vmul.f32 %v761_v31, %v3245_v44 }
 0x31f   : > { %v967_v16 = vpop.permute.xlu0 %966  ;;  %v785_v36 = vadd.f32 %v777_v32, %v769_v34  ;;  %v538_v32 = vld [vmem:[%s3397_s20 + $0x18] sm:$0xff] }
 0x320   : > { %2607 = vmatpush.xpose.msk.msra.mxu2 %vm980_vm9, %v967_v16 }
 0x321   : > { %v744_v48 = vpop.permute.xlu2 %743 }
 0x323   : > { %v740_v50 = vpop.permute.xlu1 %739 }
 0x327   : > { %v965_v24 = vpop.permute.xlu0 %964 }
 0x328   : > { %2608 = vmatpush.xpose.msk.msra.mxu2 %vm980_vm9, %v965_v24 }
 0x329   : > { %v724_v59 = vpop.permute.xlu2 %723 }
 0x32b   : > { %2609 = vmatmul.msk.f32.vlgmr.msra.gmra.mxu2 %vm980_vm9, %v784_v26  ;;  %v720_v47 = vpop.permute.xlu1 %719 }
 0x32f   : > { %v716_v35 = vpop.permute.xlu0 %715 }
 0x330   : > { %v762_v54 = vsel %vm759_vm8, %v716_v35, %v740_v50 }
 0x331   : > { %v778_v43 = vmul.f32 %v762_v54, %v3212_v33  ;;  %v764_v33 = vsel %vm759_vm8, %v720_v47, %v744_v48  ;;  %v750_v5 = vpop.permute.xlu2 %749  ;;  %v539_v54 = vld [vmem:[%s3397_s20 + $0x20] sm:$0xff] }
 0x332   : > { %v780_v62 = vmul.f32 %v764_v33, %v3207_v30 }
 0x333   : > { %2610 = vmatmul.msk.f32.gmra.mxu2 %vm980_vm9, %v785_v36  ;;  %v786_v45 = vadd.f32 %v778_v43, %v770_v37  ;;  %v746_v53 = vpop.permute.xlu1 %745  ;;  %v3411_v37 = vpop.f32.mrf.mxu1 }
 0x334   : > { %v788_v10 = vadd.f32 %v780_v62, %v772_v52  ;;  %v541_v62 = vld [vmem:[%s3397_s20 + $0x30] sm:$0xff] }
 0x337   : > { %v742_v41 = vpop.permute.xlu0 %741 }
 0x338   : > { %v763_v44 = vsel %vm759_vm8, %v718_v39, %v742_v41 }
 0x339   : > { %v779_v55 = vmul.f32 %v763_v44, %v3223_v38  ;;  %v540_v44 = vld [vmem:[%s3397_s20 + $0x28] sm:$0xff] }
 0x33b   : > { %2611 = vmatmul.msk.f32.gmra.mxu2 %vm980_vm9, %v786_v45  ;;  %v787_v1 = vadd.f32 %v779_v55, %v771_v49  ;;  %v726_v4 = vpop.permute.xlu1 %725  ;;  %v3415_v47 = vpop.f32.mrf.mxu1 }
 0x33c   : > { %v2755_v33 = vpack.i.bf16 %v3411_v37, %v3415_v47 }
 0x33f   : > { %v722_v42 = vpop.permute.xlu0 %721 }
 0x340   : > { %v765_v38 = vsel %vm759_vm8, %v722_v42, %v746_v53 }
 0x341   : > { %v781_v57 = vmul.f32 %v765_v38, %v3182_v17  ;;  %v767_v17 = vsel %vm759_vm8, %v726_v4, %v750_v5 }
 0x342   : > { %v783_v56 = vmul.f32 %v767_v17, %v3192_v22 }
 0x343   : > { %2612 = vmatmul.msk.f32.gmra.mxu2 %vm980_vm9, %v787_v1  ;;  %v789_v2 = vadd.f32 %v781_v57, %v773_v27  ;;  %v542_v57 = vld [vmem:[%s3397_s20 + $0x38] sm:$0xff] }
 0x344   : > { %v791_v6 = vadd.f32 %v783_v56, %v775_v3 }
 0x347   : > { %v748_v0 = vpop.permute.xlu0 %747 }
 0x348   : > { %v766_v30 = vsel %vm759_vm8, %v724_v59, %v748_v0 }
 0x349   : > { %v782_v63 = vmul.f32 %v766_v30, %v3176_v13 }
 0x34b   : > { %2613 = vmatmul.msk.f32.gmra.mxu2 %vm980_vm9, %v788_v10  ;;  %v790_v61 = vadd.f32 %v782_v63, %v774_v9 }
 0x353   : > { %2614 = vmatmul.msk.f32.gmra.mxu2 %vm980_vm9, %v789_v2 }
 0x35b   : > { %2615 = vmatmul.msk.f32.gmra.mxu2 %vm980_vm9, %v790_v61 }
 0x363   : > { %2616 = vmatmul.msk.f32.gmra.mxu2 %vm980_vm9, %v791_v6 }
 0x3ae   : > { %v1038_v60 = vpop.f32.mrf.mxu2 }
 0x3af   : > { %v1062_v13 = vmul.f32 0.25, %v1038_v60 }
 0x3b1   : > { %v1070_v15 = vadd.f32 %v1062_v13, %v535_v7 }
 0x3b3   : > { %v1078_v22 = vsel %vm562_vm0, %v1070_v15, -inf }
 0x3b4   : > { %1079 = vmax.xlane.f32.xlu0 %v1078_v22 }
 0x3b6   : > { %v1041_v58 = vpop.f32.mrf.mxu2 }
 0x3b7   : > { %v1063_v16 = vmul.f32 0.25, %v1041_v58 }
 0x3b9   : > { %v1071_v18 = vadd.f32 %v1063_v16, %v536_v8 }
 0x3bb   : > { %v1081_v20 = vsel %vm562_vm0, %v1071_v18, -inf }
 0x3bc   : > { %1082 = vmax.xlane.f32.xlu1 %v1081_v20 }
 0x3be   : > { %v1044_v21 = vpop.f32.mrf.mxu2 }
 0x3bf   : > { %v1064_v24 = vmul.f32 0.25, %v1044_v21 }
 0x3c1   : > { %v3404_v25 = vadd.f32 %v1064_v24, %v537_v23 }
 0x3c3   : > { %v1084_v26 = vsel %vm562_vm0, %v3404_v25, -inf }
 0x3c4   : > { %1085 = vmax.xlane.f32.xlu2 %v1084_v26 }
 0x3c6   : > { %v1047_v31 = vpop.f32.mrf.mxu2 }
 0x3c7   : > { %v1065_v34 = vmul.f32 0.25, %v1047_v31 }
 0x3c9   : > { %v1073_v35 = vadd.f32 %v1065_v34, %v538_v32 }
 0x3cb   : > { %v1087_v50 = vsel %vm562_vm0, %v1073_v35, -inf }
 0x3cc   : > { %1088 = vmax.xlane.f32.xlu0 %v1087_v50 }
 0x3ce   : > { %v1050_v36 = vpop.f32.mrf.mxu2 }
 0x3cf   : > { %v1066_v43 = vmul.f32 0.25, %v1050_v36 }
 0x3d1   : > { %v1074_v39 = vadd.f32 %v1066_v43, %v539_v54 }
 0x3d3   : > { %v1090_v41 = vsel %vm562_vm0, %v1074_v39, -inf }
 0x3d4   : > { %1091 = vmax.xlane.f32.xlu2 %v1090_v41 }
 0x3d6   : > { %v1053_v45 = vpop.f32.mrf.mxu2 }
 0x3d7   : > { %v1067_v55 = vmul.f32 0.25, %v1053_v45 }
 0x3d9   : > { %v1075_v49 = vadd.f32 %v1067_v55, %v540_v44 }
 0x3db   : > { %v1093_v48 = vsel %vm562_vm0, %v1075_v49, -inf }
 0x3dc   : > { %1094 = vmax.xlane.f32.xlu1 %v1093_v48 }
 0x3de   : > { %v1056_v1 = vpop.f32.mrf.mxu2 }
 0x3df   : > { %v1068_v42 = vmul.f32 0.25, %v1056_v1 }
 0x3e0   : > { %2756 = vrot.lane.b32.xlu0 %v2755_v33, %s2927_s14 }
 0x3e1   : > { %v1076_v52 = vadd.f32 %v1068_v42, %v541_v62 }
 0x3e3   : > { %v1096_v53 = vsel %vm562_vm0, %v1076_v52, -inf }
 0x3e4   : > { %1097 = vmax.xlane.f32.xlu2 %v1096_v53 }
 0x3e6   : > { %v1059_v10 = vpop.f32.mrf.mxu2 }
 0x3e7   : > { %v1069_v38 = vmul.f32 0.25, %v1059_v10 }
 0x3e9   : > { %v3425_v27 = vadd.f32 %v1069_v38, %v542_v57 }
 0x3eb   : > { %v1099_v59 = vsel %vm562_vm0, %v3425_v27, -inf }
 0x3f5   : > { %2761 = vrot.lane.b32.xlu1 %v2755_v33, %s2926_s13 }
 0x40a   : > { %1100 = vmax.xlane.f32.xlu0 %v1099_v59 }
 0x427   : > { %v1080_v0 = vpop.xlane.xlu0 %1079 }
 0x428   : > { %v1102_v2 = vsub.f32 %v1070_v15, %v1080_v0 }
 0x42a   : > { %v1110_v30 = vmul.f32 1.442695, %v1102_v2 }
 0x42c   : > { %2796 = vpow2.f32 %v1110_v30 }
 0x42f   : > { %v1083_v63 = vpop.xlane.xlu1 %1082 }
 0x430   : > { %v1103_v9 = vsub.f32 %v1071_v18, %v1083_v63 }
 0x432   : > { %v3429_v4 = vpop.eup %2796  ;;  %v1112_v5 = vmul.f32 1.442695, %v1103_v9 }
 0x433   : > { %v1126_v61 = vsel %vm562_vm0, %v3429_v4, 0.0 }
 0x434   : > { %2798 = vpow2.f32 %v1112_v5  ;;  %1127 = vadd.xlane.f32.xlu2 %v1126_v61 }
 0x437   : > { %v1086_v3 = vpop.xlane.xlu2 %1085 }
 0x438   : > { %v1104_v43 = vsub.f32 %v3404_v25, %v1086_v3 }
 0x43a   : > { %v3433_v17 = vpop.eup %2798  ;;  %v1114_v41 = vmul.f32 1.442695, %v1104_v43  ;;  %v1263_v43 = vld [vmem:[%s3484_s16] sm:$0xff] }
 0x43b   : > { %v1129_v56 = vsel %vm562_vm0, %v3433_v17, 0.0 }
 0x43c   : > { %1130 = vadd.xlane.f32.xlu1 %v1129_v56 }
 0x43f   : > { %v1089_v6 = vpop.xlane.xlu0 %1088 }
 0x440   : > { %v1105_v60 = vsub.f32 %v1073_v35, %v1089_v6 }
 0x442   : > { %v1116_v7 = vmul.f32 1.442695, %v1105_v60 }
 0x444   : > { %2800 = vpow2.f32 %v1116_v7 }
 0x447   : > { %v1092_v13 = vpop.xlane.xlu2 %1091 }
 0x448   : > { %v1106_v15 = vsub.f32 %v1074_v39, %v1092_v13 }
 0x44a   : > { %v3437_v22 = vpop.eup %2800  ;;  %v1118_v58 = vmul.f32 1.442695, %v1106_v15 }
 0x44b   : > { %v1135_v8 = vsel %vm562_vm0, %v3437_v22, 0.0 }
 0x44c   : > { %2802 = vpow2.f32 %v1118_v58  ;;  %2766 = vrot.lane.b32.xlu2 %v2755_v33, %s2925_s12  ;;  %1136 = vadd.xlane.f32.xlu0 %v1135_v8 }
 0x44f   : > { %v1095_v16 = vpop.xlane.xlu1 %1094 }
 0x450   : > { %v1107_v18 = vsub.f32 %v1075_v49, %v1095_v16 }
 0x452   : > { %v3442_v20 = vpop.eup %2802  ;;  %v1120_v21 = vmul.f32 1.442695, %v1107_v18  ;;  %v2757_v23 = vpop.permute.xlu0 %2756 }
 0x453   : > { %v1138_v24 = vsel %vm562_vm0, %v3442_v20, 0.0  ;;  %v2758_v26 = vunpack.i.l.bf16 %v2757_v23  ;;  %v2759_v31 = vunpack.i.h.bf16 %v2757_v23 }
 0x454   : > { %2804 = vpow2.f32 %v1120_v21  ;;  %1139 = vadd.xlane.f32.xlu0 %v1138_v24 }
 0x455   : > { %1198 = vmatpush.msra.mxu3 %v2758_v26 }
 0x457   : > { %1199 = vmatpush.msra.mxu3 %v2759_v31  ;;  %v1098_v32 = vpop.xlane.xlu2 %1097  ;;  %v1270_v31 = vld [vmem:[%s3484_s16 + $0x38] sm:$0xff] }
 0x458   : > { %v1108_v34 = vsub.f32 %v1076_v52, %v1098_v32  ;;  %v1269_v32 = vld [vmem:[%s3484_s16 + $0x30] sm:$0xff]  ;;  %1285 = vmatpush.msrb.mxu0 %v1270_v31 }
 0x45a   : > { %v3446_v35 = vpop.eup %2804  ;;  %v1122_v50 = vmul.f32 1.442695, %v1108_v34  ;;  %v1268_v34 = vld [vmem:[%s3484_s16 + $0x28] sm:$0xff]  ;;  %1286 = vmatpush.msrb.mxu0 %v1269_v32 }
 0x45b   : > { %v1141_v36 = vsel %vm562_vm0, %v3446_v35, 0.0 }
 0x45c   : > { %2806 = vpow2.f32 %v1122_v50  ;;  %1142 = vadd.xlane.f32.xlu1 %v1141_v36  ;;  %1287 = vmatpush.msrb.mxu0 %v1268_v34  ;;  %v1266_v50 = vld [vmem:[%s3484_s16 + $0x18] sm:$0xff]  ;;  %v1265_v36 = vld [vmem:[%s3484_s16 + $0x10] sm:$0xff] }
 0x45d   : > { %2808 = vpow2.f32 %v1114_v41 }
 0x462   : > { %v3450_v54 = vpop.eup %2806 }
 0x463   : > { %v1144_v39 = vsel %vm562_vm0, %v3450_v54, 0.0  ;;  %v2809_v49 = vpop.eup %2808 }
 0x464   : > { %1145 = vadd.xlane.f32.xlu0 %v1144_v39  ;;  %v1132_v48 = vsel %vm562_vm0, %v2809_v49, 0.0 }
 0x467   : > { %v2762_v45 = vpop.permute.xlu1 %2761 }
 0x468   : > { %v2763_v44 = vunpack.i.l.bf16 %v2762_v45  ;;  %v2764_v55 = vunpack.i.h.bf16 %v2762_v45 }
 0x46a   : > { %1200 = vmatpush.msra.mxu3 %v2763_v44 }
 0x46c   : > { %1201 = vmatpush.msra.mxu3 %v2764_v55 }
 0x475   : > { %1133 = vadd.xlane.f32.xlu2 %v1132_v48 }
 0x47d   : > { %v1101_v1 = vpop.xlane.xlu0 %1100 }
 0x47e   : > { %v1109_v33 = vsub.f32 %v3425_v27, %v1101_v1 }
 0x480   : > { %v1124_v62 = vmul.f32 1.442695, %v1109_v33 }
 0x482   : > { %2810 = vpow2.f32 %v1124_v62 }
 0x488   : > { %v2811_v25 = vpop.eup %2810 }
 0x489   : > { %v1147_v42 = vsel %vm562_vm0, %v2811_v25, 0.0 }
 0x48a   : > { %1148 = vadd.xlane.f32.xlu1 %v1147_v42 }
 0x4a7   : > { %v1128_v52 = vpop.xlane.xlu2 %1127 }
 0x4a8   : > { %2812 = vrcp.f32 %v1128_v52 }
 0x4ae   : > { %v2813_v59 = vpop.eup %2812 }
 0x4af   : > { %v2767_v53 = vpop.permute.xlu2 %2766  ;;  %v1131_v57 = vpop.xlane.xlu1 %1130  ;;  %v1158_v27 = vmul.f32 %v2813_v59, %v3429_v4 }
 0x4b0   : > { %v2768_v10 = vunpack.i.l.bf16 %v2767_v53  ;;  %v2769_v38 = vunpack.i.h.bf16 %v2767_v53  ;;  %2814 = vrcp.f32 %v1131_v57  ;;  %v2890_v53 = vld [vmem:[%s3010_s22] sm:$0xff] }
 0x4b2   : > { %1202 = vmatpush.msra.mxu3 %v2768_v10 }
 0x4b4   : > { %1203 = vmatpush.msra.mxu3 %v2769_v38 }
 0x4b6   : > { %1204 = vmatpush.msra.mxu3 %v3415_v47  ;;  %v2815_v0 = vpop.eup %2814 }
 0x4b7   : > { %v1159_v2 = vmul.f32 %v2815_v0, %v3433_v17 }
 0x4b8   : > { %1205 = vmatpush.msra.mxu3 %v3411_v37 }
 0x4b9   : > { %2617 = vmatmul.msk.f32.vlgmr.msra.gmra.mxu3 %vm562_vm0, %v1158_v27  ;;  %v2891_v27 = vld [vmem:[%s3010_s22 + $0x8] sm:$0xff] }
 0x4bf   : > { %v1137_v63 = vpop.xlane.xlu0 %1136 }
 0x4c1   : > { %2618 = vmatmul.msk.f32.gmra.mxu3 %vm562_vm0, %v1159_v2 }
 0x4c7   : > { %v1140_v47 = vpop.xlane.xlu0 %1139 }
 0x4cf   : > { %v1143_v4 = vpop.xlane.xlu1 %1142 }
 0x4d7   : > { %v1146_v3 = vpop.xlane.xlu0 %1145 }
 0x4e8   : > { %v1134_v30 = vpop.xlane.xlu2 %1133 }
 0x4e9   : > { %2816 = vrcp.f32 %v1134_v30 }
 0x4ea   : > { %2818 = vrcp.f32 %v1137_v63 }
 0x4eb   : > { %2820 = vrcp.f32 %v1140_v47 }
 0x4ec   : > { %2822 = vrcp.f32 %v1143_v4 }
 0x4ed   : > { %2824 = vrcp.f32 %v1146_v3 }
 0x4ef   : > { %v2817_v9 = vpop.eup %2816 }
 0x4f0   : > { %v1160_v5 = vmul.f32 %v2817_v9, %v2809_v49  ;;  %v2819_v61 = vpop.eup %2818 }
 0x4f1   : > { %v1161_v37 = vmul.f32 %v2819_v61, %v3437_v22  ;;  %v2821_v56 = vpop.eup %2820 }
 0x4f2   : > { %2619 = vmatmul.msk.f32.gmra.mxu3 %vm562_vm0, %v1160_v5  ;;  %v1162_v17 = vmul.f32 %v2821_v56, %v3442_v20  ;;  %v2823_v6 = vpop.eup %2822 }
 0x4f3   : > { %v1163_v60 = vmul.f32 %v2823_v6, %v3446_v35  ;;  %v2825_v13 = vpop.eup %2824  ;;  %v1267_v35 = vld [vmem:[%s3484_s16 + $0x20] sm:$0xff] }
 0x4f4   : > { %v1164_v15 = vmul.f32 %v2825_v13, %v3450_v54  ;;  %1288 = vmatpush.msrb.mxu0 %v1267_v35  ;;  %v1264_v54 = vld [vmem:[%s3484_s16 + $0x8] sm:$0xff] }
 0x4f6   : > { %1289 = vmatpush.msrb.mxu0 %v1266_v50 }
 0x4f8   : > { %1290 = vmatpush.msrb.mxu0 %v1265_v36  ;;  %v2787_v36 = vld [vmem:[%s3518_s25] ss:$0 sm:$0xff] }
 0x4fa   : > { %2620 = vmatmul.msk.f32.gmra.mxu3 %vm562_vm0, %v1161_v37  ;;  %1291 = vmatpush.msrb.mxu0 %v1264_v54 }
 0x4fc   : > { %1292 = vmatpush.msrb.mxu0 %v1263_v43 }
 0x4fd   : > { %v1149_v7 = vpop.xlane.xlu1 %1148 }
 0x4fe   : > { %2826 = vrcp.f32 %v1149_v7 }
 0x502   : > { %2621 = vmatmul.msk.f32.gmra.mxu3 %vm562_vm0, %v1162_v17 }
 0x504   : > { %v2827_v22 = vpop.eup %2826 }
 0x505   : > { %v1165_v58 = vmul.f32 %v2827_v22, %v2811_v25 }
 0x50a   : > { %2622 = vmatmul.msk.f32.gmra.mxu3 %vm562_vm0, %v1163_v60 }
 0x512   : > { %2623 = vmatmul.msk.f32.gmra.mxu3 %vm562_vm0, %v1164_v15 }
 0x51a   : > { %2624 = vmatmul.msk.f32.gmra.mxu3 %vm562_vm0, %v1165_v58 }
 0x53c   : > { %v1207_v8 = vpop.f32.mrf.mxu3 }
 0x544   : > { %v1210_v16 = vpop.f32.mrf.mxu3 }
 0x575   : > { %v1213_v18 = vpop.f32.mrf.mxu3 }
 0x576   : > { %1233 = vrot.lane.b32.xlu2 %v1213_v18, %s4066_s28 }
 0x57d   : > { %v1216_v20 = vpop.f32.mrf.mxu3 }
 0x585   : > { %v1219_v21 = vpop.f32.mrf.mxu3 }
 0x586   : > { %1241 = vrot.lane.b32.xlu0 %v1219_v21, %s4064_s29 }
 0x58d   : > { %v1222_v23 = vpop.f32.mrf.mxu3 }
 0x58e   : > { %1235 = vrot.lane.b32.xlu0 %v1216_v20, %s4066_s28  ;;  %1243 = vrot.lane.b32.xlu2 %v1222_v23, %s4064_s29  ;;  %s3524_s28 = scalar_lea.vmem %s4050_s8, %s3034_s27 }
 0x58f   : > { %v1356_v63 = vld [vmem:[%s3524_s28 + $0x70] sm:$0xff]  ;;  %v1357_v9 = vld [vmem:[%s3524_s28 + $0x78] sm:$0xff]  ;;  %v1354_v5 = vld [vmem:[%s3524_s28 + $0x60] sm:$0xff] }
 0x590   : > { %1372 = vmatpush.msrb.mxu1 %v1356_v63  ;;  %1395 = vmatpush.msra.mxu0 %v1357_v9  ;;  %v1355_v47 = vld [vmem:[%s3524_s28 + $0x68] sm:$0xff]  ;;  %v1352_v61 = vld [vmem:[%s3524_s28 + $0x50] sm:$0xff]  ;;  %v1353_v37 = vld [vmem:[%s3524_s28 + $0x58] sm:$0xff] }
 0x591   : > { %v1350_v4 = vld [vmem:[%s3524_s28 + $0x40] sm:$0xff]  ;;  %v1351_v56 = vld [vmem:[%s3524_s28 + $0x48] sm:$0xff]  ;;  %v1348_v17 = vld [vmem:[%s3524_s28 + $0x30] sm:$0xff] }
 0x592   : > { %1373 = vmatpush.msrb.mxu1 %v1354_v5  ;;  %1396 = vmatpush.msra.mxu0 %v1355_v47  ;;  %v1349_v3 = vld [vmem:[%s3524_s28 + $0x38] sm:$0xff]  ;;  %v1346_v6 = vld [vmem:[%s3524_s28 + $0x20] sm:$0xff]  ;;  %v1347_v60 = vld [vmem:[%s3524_s28 + $0x28] sm:$0xff] }
 0x593   : > { %v1344_v7 = vld [vmem:[%s3524_s28 + $0x10] sm:$0xff]  ;;  %v1345_v13 = vld [vmem:[%s3524_s28 + $0x18] sm:$0xff]  ;;  %v1342_v15 = vld [vmem:[%s3524_s28] sm:$0xff] }
 0x594   : > { %1374 = vmatpush.msrb.mxu1 %v1352_v61  ;;  %1397 = vmatpush.msra.mxu0 %v1353_v37  ;;  %v1343_v22 = vld [vmem:[%s3524_s28 + $0x8] sm:$0xff] }
 0x595   : > { %v1225_v24 = vpop.f32.mrf.mxu3 }
 0x596   : > { %1249 = vrot.lane.b32.xlu1 %v1225_v24, %s4062_s19  ;;  %1375 = vmatpush.msrb.mxu1 %v1350_v4 }
 0x597   : > { %1398 = vmatpush.msra.mxu0 %v1351_v56 }
 0x598   : > { %1376 = vmatpush.msrb.mxu1 %v1348_v17 }
 0x599   : > { %1399 = vmatpush.msra.mxu0 %v1349_v3 }
 0x59a   : > { %1377 = vmatpush.msrb.mxu1 %v1346_v6 }
 0x59b   : > { %1400 = vmatpush.msra.mxu0 %v1347_v60 }
 0x59c   : > { %1378 = vmatpush.msrb.mxu1 %v1344_v7 }
 0x59d   : > { %v1228_v26 = vpop.f32.mrf.mxu3  ;;  %1401 = vmatpush.msra.mxu0 %v1345_v13 }
 0x59e   : > { %1251 = vrot.lane.b32.xlu1 %v1228_v26, %s4062_s19  ;;  %1379 = vmatpush.msrb.mxu1 %v1342_v15  ;;  %s3555_s19 = scalar_lea.vmem %s4051_s9, %s3034_s27 }
 0x59f   : > { %1402 = vmatpush.msra.mxu0 %v1343_v22  ;;  %v1455_v63 = vld [vmem:[%s3555_s19 + $0x18] sm:$0xff]  ;;  %v1454_v9 = vld [vmem:[%s3555_s19 + $0x10] sm:$0xff]  ;;  %v1453_v5 = vld [vmem:[%s3555_s19 + $0x8] sm:$0xff] }
 0x5a0   : > { %v1452_v47 = vld [vmem:[%s3555_s19] sm:$0xff] }
 0x5d0   : > { %v1234_v41 = vpop.permute.xlu2 %1233 }
 0x5d1   : > { %v1255_v45 = vsel %vm980_vm9, %v1207_v8, %v1234_v41 }
 0x5e8   : > { %v1244_v33 = vpop.permute.xlu2 %1243 }
 0x5f8   : > { %v1242_v39 = vpop.permute.xlu0 %1241 }
 0x5f9   : > { %v1258_v44 = vsel %vm1257_vm10, %v1255_v45, %v1242_v39 }
 0x600   : > { %v1236_v48 = vpop.permute.xlu0 %1235 }
 0x601   : > { %v1256_v1 = vsel %vm980_vm9, %v1210_v16, %v1236_v48 }
 0x602   : > { %v1259_v25 = vsel %vm1257_vm10, %v1256_v1, %v1244_v33  ;;  %v1467_v33 = vld [vmem:[%s3555_s19 + $0x78] sm:$0xff] }
 0x603   : > { %1468 = vmatpush.msra.mxu1 %v1467_v33 }
 0x608   : > { %v1250_v55 = vpop.permute.xlu1 %1249 }
 0x609   : > { %v1261_v49 = vsel %vm1260_vm11, %v1258_v44, %v1250_v55 }
 0x60a   : > { %2625 = vmatmul.msk.f32.vlgmr.msrb.gmra.mxu0 %vm562_vm0, %v1261_v49 }
 0x610   : > { %v1252_v62 = vpop.permute.xlu1 %1251 }
 0x611   : > { %v1262_v42 = vsel %vm1260_vm11, %v1259_v25, %v1252_v62  ;;  %v1466_v62 = vld [vmem:[%s3555_s19 + $0x70] sm:$0xff]  ;;  %v1465_v25 = vld [vmem:[%s3555_s19 + $0x68] sm:$0xff] }
 0x612   : > { %2626 = vmatmul.msk.f32.gmra.mxu0 %vm562_vm0, %v1262_v42  ;;  %1469 = vmatpush.msra.mxu1 %v1466_v62  ;;  %v1464_v42 = vld [vmem:[%s3555_s19 + $0x60] sm:$0xff] }
 0x614   : > { %1470 = vmatpush.msra.mxu1 %v1465_v25 }
 0x616   : > { %1471 = vmatpush.msra.mxu1 %v1464_v42 }
 0x687   : > { %v1294_v52 = vpop.f32.mrf.mxu0 }
 0x688   : > { %v3503_v10 = vadd.f32 %v2890_v53, %v1294_v52  ;;  %v1463_v52 = vld [vmem:[%s3555_s19 + $0x58] sm:$0xff]  ;;  %v1462_v53 = vld [vmem:[%s3555_s19 + $0x50] sm:$0xff] }
 0x689   : > { %1472 = vmatpush.msra.mxu1 %v1463_v52 }
 0x68a   : > { %v1303_v38 = vmul.f32 %v3503_v10, %v3503_v10 }
 0x68b   : > { %1473 = vmatpush.msra.mxu1 %v1462_v53  ;;  %v2646_v53 = vld [vmem:[%s3040_s30 + $0xe0] sm:$0xff] }
 0x68c   : > { %v1305_v57 = vsel %vm562_vm0, %v1303_v38, 0.0  ;;  %v1461_v38 = vld [vmem:[%s3555_s19 + $0x48] sm:$0xff] }
 0x68d   : > { %1306 = vadd.xlane.f32.xlu0 %v1305_v57  ;;  %1474 = vmatpush.msra.mxu1 %v1461_v38  ;;  %v1460_v57 = vld [vmem:[%s3555_s19 + $0x40] sm:$0xff]  ;;  %v2644_v38 = vld [vmem:[%s3040_s30 + $0xd0] sm:$0xff] }
 0x68f   : > { %v1297_v59 = vpop.f32.mrf.mxu0  ;;  %1475 = vmatpush.msra.mxu1 %v1460_v57  ;;  %v2640_v57 = vld [vmem:[%s3040_s30 + $0xb0] sm:$0xff] }
 0x690   : > { %v3509_v0 = vadd.f32 %v2891_v27, %v1297_v59  ;;  %v1459_v59 = vld [vmem:[%s3555_s19 + $0x38] sm:$0xff]  ;;  %v1458_v27 = vld [vmem:[%s3555_s19 + $0x30] sm:$0xff] }
 0x691   : > { %1476 = vmatpush.msra.mxu1 %v1459_v59  ;;  %v2638_v59 = vld [vmem:[%s3040_s30 + $0xa0] sm:$0xff] }
 0x692   : > { %v1304_v2 = vmul.f32 %v3509_v0, %v3509_v0 }
 0x693   : > { %1477 = vmatpush.msra.mxu1 %v1458_v27  ;;  %v2636_v27 = vld [vmem:[%s3040_s30 + $0x90] sm:$0xff] }
 0x694   : > { %v1308_v30 = vsel %vm562_vm0, %v1304_v2, 0.0  ;;  %v1457_v2 = vld [vmem:[%s3555_s19 + $0x28] sm:$0xff] }
 0x695   : > { %1309 = vadd.xlane.f32.xlu2 %v1308_v30  ;;  %1478 = vmatpush.msra.mxu1 %v1457_v2  ;;  %v1456_v30 = vld [vmem:[%s3555_s19 + $0x20] sm:$0xff] }
 0x696   : > { %v2634_v2 = vld [vmem:[%s3040_s30 + $0x80] sm:$0xff] }
 0x697   : > { %1479 = vmatpush.msra.mxu1 %v1456_v30  ;;  %v2649_v30 = vld [vmem:[%s3040_s30 + $0xf8] sm:$0xff] }
 0x699   : > { %1480 = vmatpush.msra.mxu1 %v1455_v63  ;;  %v2647_v63 = vld [vmem:[%s3040_s30 + $0xe8] sm:$0xff] }
 0x69b   : > { %1481 = vmatpush.msra.mxu1 %v1454_v9  ;;  %v2645_v9 = vld [vmem:[%s3040_s30 + $0xd8] sm:$0xff] }
 0x69d   : > { %1482 = vmatpush.msra.mxu1 %v1453_v5  ;;  %v2643_v5 = vld [vmem:[%s3040_s30 + $0xc8] sm:$0xff] }
 0x69f   : > { %1483 = vmatpush.msra.mxu1 %v1452_v47 }
 0x700   : > { %v1307_v58 = vpop.xlane.xlu0 %1306 }
 0x701   : > { %v1311_v8 = vmul.f32 %v1307_v58, %v3058_v28 }
 0x703   : > { %v1313_v16 = vadd.f32 1e-05, %v1311_v8 }
 0x705   : > { %2828 = vrsqrt.f32 %v1313_v16  ;;  %vm1321_vm13 = vweird.f32 %v1313_v16 }
 0x708   : > { %v1310_v18 = vpop.xlane.xlu2 %1309 }
 0x709   : > { %v1312_v20 = vmul.f32 %v1310_v18, %v3058_v28 }
 0x70b   : > { %v2829_v21 = vpop.eup %2828  ;;  %v1314_v23 = vadd.f32 1e-05, %v1312_v20 }
 0x70c   : > { %v1316_v24 = vmul.f32 %v2829_v21, %v1313_v16  ;;  %vm1322_vm12 = vweird.f32 %v2829_v21 }
 0x70d   : > { %2830 = vrsqrt.f32 %v1314_v23  ;;  %vm1323_vm14 = vmor %vm1321_vm13, %vm1322_vm12  ;;  %vm1331_vm1 = vweird.f32 %v1314_v23 }
 0x70e   : > { %v1317_v26 = vmul.f32 %v2829_v21, %v1316_v24 }
 0x710   : > { %v1318_v31 = vmul.f32 0.5, %v1317_v26 }
 0x712   : > { %v1319_v32 = vsub.f32 1.5, %v1318_v31 }
 0x713   : > { %v2831_v34 = vpop.eup %2830 }
 0x714   : > { %v1320_v35 = vmul.f32 %v2829_v21, %v1319_v32  ;;  %v1326_v50 = vmul.f32 %v2831_v34, %v1314_v23  ;;  %vm1332_vm15 = vweird.f32 %v2831_v34 }
 0x715   : > { %vm1333_vm2 = vmor %vm1331_vm1, %vm1332_vm15 }
 0x716   : > { %v1324_v54 = vsel %vm1323_vm14, %v2829_v21, %v1320_v35  ;;  %v1327_v43 = vmul.f32 %v2831_v34, %v1326_v50 }
 0x717   : > { %v1335_v39 = vmul.f32 %v1324_v54, %v3503_v10 }
 0x718   : > { %v1328_v41 = vmul.f32 0.5, %v1327_v43 }
 0x719   : > { %v1340_v45 = vmul.f32 %v2787_v36, %v1335_v39 }
 0x71a   : > { %v1329_v44 = vsub.f32 1.5, %v1328_v41 }
 0x71b   : > { %2627 = vmatmul.msk.f32.vlgmr.msrb.gmra.mxu1 %vm562_vm0, %v1340_v45  ;;  %2629 = vmatmul.msk.f32.vlgmr.msra.gmra.mxu0 %vm562_vm0, %v1340_v45 }
 0x71c   : > { %v1330_v55 = vmul.f32 %v2831_v34, %v1329_v44 }
 0x71e   : > { %v1334_v49 = vsel %vm1333_vm2, %v2831_v34, %v1330_v55 }
 0x71f   : > { %v1336_v48 = vmul.f32 %v1334_v49, %v3509_v0 }
 0x721   : > { %v1341_v1 = vmul.f32 %v2787_v36, %v1336_v48 }
 0x723   : > { %2628 = vmatmul.msk.f32.gmra.mxu1 %vm562_vm0, %v1341_v1  ;;  %2630 = vmatmul.msk.f32.gmra.mxu0 %vm562_vm0, %v1341_v1 }
 0x798   : > { %v1381_v61 = vpop.f32.mrf.mxu1  ;;  %v1404_v26 = vpop.f32.mrf.mxu0 }
 0x799   : > { %v2631_v37 = vmul.f32 -1.442695, %v1381_v61 }
 0x79b   : > { %2832 = vpow2.f32 %v2631_v37 }
 0x7a0   : > { %v1384_v4 = vpop.f32.mrf.mxu1  ;;  %v1407_v44 = vpop.f32.mrf.mxu0 }
 0x7a1   : > { %v2833_v56 = vpop.eup %2832  ;;  %v2632_v17 = vmul.f32 -1.442695, %v1384_v4 }
 0x7a2   : > { %v1416_v3 = vadd.f32 1.0, %v2833_v56  ;;  %v2639_v56 = vld [vmem:[%s3040_s30 + $0xa8] sm:$0xff] }
 0x7a3   : > { %2834 = vpow2.f32 %v2632_v17  ;;  %v2637_v17 = vld [vmem:[%s3040_s30 + $0x98] sm:$0xff] }
 0x7a4   : > { %2836 = vrcp.f32 %v1416_v3  ;;  %v1429_v22 = vand.u32 2147483648, %v1416_v3  ;;  %v1427_v8 = vand.u32 2147483647, %v1416_v3  ;;  %vm1423_vm4 = vweird.f32 %v1416_v3 }
 0x7a6   : > { %v1430_v20 = vor.u32 1.1754944e-38, %v1429_v22  ;;  %vm1428_vm6 = vcmp.eq.f32.partialorder %v1427_v8, 8.507059e+37 }
 0x7a9   : > { %v2835_v6 = vpop.eup %2834 }
 0x7aa   : > { %v2837_v60 = vpop.eup %2836  ;;  %v1417_v7 = vadd.f32 1.0, %v2835_v6 }
 0x7ab   : > { %v1419_v13 = vmul.f32 %v2837_v60, %v1416_v3  ;;  %vm1424_vm3 = vweird.f32 %v2837_v60  ;;  %v2635_v3 = vld [vmem:[%s3040_s30 + $0x88] sm:$0xff] }
 0x7ac   : > { %2838 = vrcp.f32 %v1417_v7  ;;  %vm1425_vm5 = vmor %vm1423_vm4, %vm1424_vm3  ;;  %v1444_v34 = vand.u32 2147483648, %v1417_v7  ;;  %v1442_v36 = vand.u32 2147483647, %v1417_v7  ;;  %vm1438_vm12 = vweird.f32 %v1417_v7 }
 0x7ad   : > { %v1420_v15 = vsub.f32 1.0, %v1419_v13 }
 0x7ae   : > { %v1445_v43 = vor.u32 1.1754944e-38, %v1444_v34  ;;  %vm1443_vm14 = vcmp.eq.f32.partialorder %v1442_v36, 8.507059e+37 }
 0x7af   : > { %v1421_v58 = vmul.f32 %v2837_v60, %v1420_v15 }
 0x7b1   : > { %v1422_v16 = vadd.f32 %v2837_v60, %v1421_v58 }
 0x7b2   : > { %v2839_v18 = vpop.eup %2838 }
 0x7b3   : > { %v1426_v21 = vsel %vm1425_vm5, %v2837_v60, %v1422_v16  ;;  %v1434_v23 = vmul.f32 %v2839_v18, %v1417_v7  ;;  %vm1439_vm7 = vweird.f32 %v2839_v18 }
 0x7b4   : > { %v1431_v24 = vsel %vm1428_vm6, %v1430_v20, %v1426_v21  ;;  %vm1440_vm13 = vmor %vm1438_vm12, %vm1439_vm7  ;;  %v2786_v21 = vld [vmem:[%s3031_s26 + $0x1] ss:$0 sm:$0xff]  ;;  %s4068_s26 = smov 56  }
 0x7b5   : > { %v1448_v31 = vmul.f32 %v1431_v24, %v1381_v61  ;;  %v1435_v32 = vsub.f32 1.0, %v1434_v23 }
 0x7b7   : > { %v1450_v35 = vmul.f32 %v1448_v31, %v1404_v26  ;;  %v1436_v50 = vmul.f32 %v2839_v18, %v1435_v32 }
 0x7b9   : > { %v1437_v54 = vadd.f32 %v2839_v18, %v1436_v50  ;;  %1484 = vmatmul.f32.vlgmr.msra.gmra.mxu1 %v1450_v35 }
 0x7bb   : > { %v1441_v39 = vsel %vm1440_vm13, %v2839_v18, %v1437_v54 }
 0x7bc   : > { %v1446_v41 = vsel %vm1443_vm14, %v1445_v43, %v1441_v39 }
 0x7bd   : > { %v1449_v45 = vmul.f32 %v1446_v41, %v1384_v4  ;;  %v2641_v4 = vld [vmem:[%s3040_s30 + $0xb8] sm:$0xff] }
 0x7bf   : > { %v1451_v55 = vmul.f32 %v1449_v45, %v1407_v44 }
 0x7c1   : > { %1487 = vmatmul.f32.gmra.mxu1 %v1451_v55 }
 0x836   : > { %v1485_v49 = vpop.f32.mrf.mxu1 }
 0x837   : > { %v3574_v48 = vadd.f32 %v1485_v49, %v3503_v10  ;;  %v2648_v10 = vld [vmem:[%s3040_s30 + $0xf0] sm:$0xff] }
 0x838   : > { %1565 = vmatpush.msrb.mxu0 %v2648_v10 }
 0x839   : > { %v1495_v1 = vmul.f32 %v3574_v48, %v3574_v48 }
 0x83a   : > { %1566 = vmatpush.msrb.mxu0 %v2646_v53 }
 0x83b   : > { %v1497_v33 = vsel %vm562_vm0, %v1495_v1, 0.0 }
 0x83c   : > { %1498 = vadd.xlane.f32.xlu1 %v1497_v33  ;;  %1567 = vmatpush.msrb.mxu0 %v2644_v38 }
 0x83e   : > { %v1488_v62 = vpop.f32.mrf.mxu1 }
 0x83f   : > { %v3580_v25 = vadd.f32 %v1488_v62, %v3509_v0  ;;  %v2642_v0 = vld [vmem:[%s3040_s30 + $0xc0] sm:$0xff] }
 0x840   : > { %1568 = vmatpush.msrb.mxu0 %v2642_v0 }
 0x841   : > { %v1496_v42 = vmul.f32 %v3580_v25, %v3580_v25 }
 0x842   : > { %1569 = vmatpush.msrb.mxu0 %v2640_v57 }
 0x843   : > { %v1500_v52 = vsel %vm562_vm0, %v1496_v42, 0.0 }
 0x844   : > { %1501 = vadd.xlane.f32.xlu0 %v1500_v52  ;;  %1570 = vmatpush.msrb.mxu0 %v2638_v59 }
 0x846   : > { %1571 = vmatpush.msrb.mxu0 %v2636_v27 }
 0x848   : > { %1572 = vmatpush.msrb.mxu0 %v2634_v2 }
 0x84a   : > { %1588 = vmatpush.msra.mxu0 %v2649_v30  ;;  %v3690_v30 = vld [vmem:[%s4045_s3 + $0x38] sm:$0xff] }
 0x84c   : > { %1589 = vmatpush.msra.mxu0 %v2647_v63 }
 0x84e   : > { %1590 = vmatpush.msra.mxu0 %v2645_v9 }
 0x850   : > { %1591 = vmatpush.msra.mxu0 %v2643_v5 }
 0x852   : > { %1592 = vmatpush.msra.mxu0 %v2641_v4 }
 0x854   : > { %1593 = vmatpush.msra.mxu0 %v2639_v56 }
 0x856   : > { %1594 = vmatpush.msra.mxu0 %v2637_v17  ;;  %v3706_v17 = vld [vmem:[%s4045_s3 + $0x30] sm:$0xff] }
 0x858   : > { %1595 = vmatpush.msra.mxu0 %v2635_v3 }
 0x8af   : > { %v1499_v47 = vpop.xlane.xlu1 %1498 }
 0x8b0   : > { %v1503_v61 = vmul.f32 %v1499_v47, %v3058_v28 }
 0x8b2   : > { %v1505_v37 = vadd.f32 1e-05, %v1503_v61  ;;  %v3698_v61 = vld [vmem:[%s4045_s3 + $0x20] sm:$0xff] }
 0x8b4   : > { %2840 = vrsqrt.f32 %v1505_v37  ;;  %vm1513_vm1 = vweird.f32 %v1505_v37 }
 0x8b7   : > { %v1502_v6 = vpop.xlane.xlu0 %1501 }
 0x8b8   : > { %v1504_v60 = vmul.f32 %v1502_v6, %v3058_v28 }
 0x8ba   : > { %v2841_v7 = vpop.eup %2840  ;;  %v1506_v13 = vadd.f32 1e-05, %v1504_v60 }
 0x8bb   : > { %v1508_v15 = vmul.f32 %v2841_v7, %v1505_v37  ;;  %vm1514_vm15 = vweird.f32 %v2841_v7 }
 0x8bc   : > { %2842 = vrsqrt.f32 %v1506_v13  ;;  %vm1515_vm2 = vmor %vm1513_vm1, %vm1514_vm15  ;;  %vm1523_vm4 = vweird.f32 %v1506_v13 }
 0x8bd   : > { %v1509_v22 = vmul.f32 %v2841_v7, %v1508_v15 }
 0x8bf   : > { %v1510_v58 = vmul.f32 0.5, %v1509_v22 }
 0x8c1   : > { %v1511_v8 = vsub.f32 1.5, %v1510_v58 }
 0x8c2   : > { %v2843_v16 = vpop.eup %2842 }
 0x8c3   : > { %v1512_v18 = vmul.f32 %v2841_v7, %v1511_v8  ;;  %v1518_v20 = vmul.f32 %v2843_v16, %v1506_v13  ;;  %vm1524_vm3 = vweird.f32 %v2843_v16  ;;  %v3714_v13 = vld [vmem:[%s4045_s3 + $0x28] sm:$0xff] }
 0x8c4   : > { %vm1525_vm5 = vmor %vm1523_vm4, %vm1524_vm3  ;;  %vm2394_vm4 = vcmask 1041409  }
 0x8c5   : > { %v1516_v23 = vsel %vm1515_vm2, %v2841_v7, %v1512_v18  ;;  %v1519_v24 = vmul.f32 %v2843_v16, %v1518_v20  ;;  %v3722_v18 = vld [vmem:[%s4045_s3 + $0x18] sm:$0xff] }
 0x8c6   : > { %v1527_v26 = vmul.f32 %v1516_v23, %v3574_v48 }
 0x8c7   : > { %v1520_v31 = vmul.f32 0.5, %v1519_v24 }
 0x8c8   : > { %v1532_v32 = vmul.f32 %v2786_v21, %v1527_v26 }
 0x8c9   : > { %v1521_v34 = vsub.f32 1.5, %v1520_v31 }
 0x8ca   : > { %2650 = vmatmul.msk.f32.vlgmr.msrb.gmra.mxu0 %vm562_vm0, %v1532_v32 }
 0x8cb   : > { %v1522_v35 = vmul.f32 %v2843_v16, %v1521_v34 }
 0x8cd   : > { %v1526_v50 = vsel %vm1525_vm5, %v2843_v16, %v1522_v35  ;;  %v3737_v35 = vld [vmem:[%s4045_s3 + $0x8] sm:$0xff]  ;;  %vm2397_vm5 = vcmask 517120  }
 0x8ce   : > { %v1528_v36 = vmul.f32 %v1526_v50, %v3580_v25 }
 0x8d0   : > { %v1533_v54 = vmul.f32 %v2786_v21, %v1528_v36 }
 0x8d2   : > { %2651 = vmatmul.msk.f32.gmra.mxu0 %vm562_vm0, %v1533_v54 }
 0x8da   : > { %2652 = vmatmul.msk.f32.vlgmr.msra.gmra.mxu0 %vm562_vm0, %v1532_v32  ;;  %v3731_v32 = vld [vmem:[%s4045_s3 + $0x10] sm:$0xff] }
 0x8e2   : > { %2653 = vmatmul.msk.f32.gmra.mxu0 %vm562_vm0, %v1533_v54 }
 0x947   : > { %v3610_v43 = vpop.f32.mrf.mxu0 }
 0x948   : > { %1617 = vrot.lane.b32.xlu1 %v3610_v43, %s2927_s14  ;;  %v1623_v0 = vsub.f32 0.0, %v3610_v43 }
 0x94f   : > { %v3614_v39 = vpop.f32.mrf.mxu0 }
 0x950   : > { %1605 = vrot.lane.b32.xlu1 %v3610_v43, %s2925_s12  ;;  %1613 = vrot.lane.b32.xlu0 %v3614_v39, %s2926_s13  ;;  %v1624_v38 = vsub.f32 0.0, %v3614_v39 }
 0x951   : > { %1619 = vrot.lane.b32.xlu2 %v3614_v39, %s2927_s14 }
 0x958   : > { %1607 = vrot.lane.b32.xlu0 %v3614_v39, %s2925_s12 }
 0x959   : > { %1611 = vrot.lane.b32.xlu2 %v3610_v43, %s2926_s13 }
 0x9ab   : > { %v3626_v41 = vpop.permute.xlu2 %1619 }
 0x9ac   : > { %1757 = vrot.lane.b32.xlu0 %v3626_v41, %s2928_s15  ;;  %v1630_v49 = vsub.f32 0.0, %v3626_v41 }
 0x9b3   : > { %v3630_v45 = vpop.permute.xlu2 %1611 }
 0x9b4   : > { %1751 = vrot.lane.b32.xlu0 %v3630_v45, %s2928_s15  ;;  %v1627_v42 = vsub.f32 0.0, %v3630_v45 }
 0x9ba   : > { %v3634_v44 = vpop.permute.xlu1 %1617 }
 0x9bb   : > { %1755 = vrot.lane.b32.xlu2 %v3634_v44, %s2928_s15  ;;  %v1629_v55 = vsub.f32 0.0, %v3634_v44 }
 0x9bd   : > { %1731 = vrot.lane.b32.xlu1 %v1629_v55, %s4068_s26 }
 0x9c2   : > { %v3643_v1 = vpop.permute.xlu0 %1613  ;;  %v3654_v62 = vpop.permute.xlu1 %1605 }
 0x9c3   : > { %1733 = vrot.lane.b32.xlu2 %v1630_v49, %s4068_s26  ;;  %v1628_v33 = vsub.f32 0.0, %v3643_v1  ;;  %v1625_v53 = vsub.f32 0.0, %v3654_v62 }
 0x9c5   : > { %1753 = vrot.lane.b32.xlu1 %v3643_v1, %s2928_s15  ;;  %1729 = vrot.lane.b32.xlu0 %v1628_v33, %s4068_s26 }
 0x9ca   : > { %v3657_v52 = vpop.permute.xlu0 %1607 }
 0x9cb   : > { %1727 = vrot.lane.b32.xlu2 %v1627_v42, %s4068_s26  ;;  %v1626_v10 = vsub.f32 0.0, %v3657_v52 }
 0x9cd   : > { %1725 = vrot.lane.b32.xlu1 %v1626_v10, %s4068_s26  ;;  %1723 = vrot.lane.b32.xlu0 %v1625_v53, %s4068_s26 }
 0x9d3   : > { %1749 = vrot.lane.b32.xlu2 %v3657_v52, %s2928_s15 }
 0x9d5   : > { %1747 = vrot.lane.b32.xlu1 %v3654_v62, %s2928_s15  ;;  %1745 = vrot.lane.b32.xlu0 %v3614_v39, %s2928_s15 }
 0x9db   : > { %1721 = vrot.lane.b32.xlu2 %v1624_v38, %s4068_s26 }
 0x9dd   : > { %1719 = vrot.lane.b32.xlu1 %v1623_v0, %s4068_s26 }
 0x9e3   : > { %1743 = vrot.lane.b32.xlu2 %v3610_v43, %s2928_s15  ;;  %s4071_s15 = smov 120  }
 0xa15   : > { %v1756_v57 = vpop.permute.xlu2 %1755 }
 0xa1d   : > { %v1734_v59 = vpop.permute.xlu2 %1733 }
 0xa1e   : > { %v1758_v27 = vpop.permute.xlu0 %1757 }
 0xa1f   : > { %v1774_v2 = vsel %vm759_vm8, %v1734_v59, %v1758_v27  ;;  %v3746_v59 = vld [vmem:[%s4045_s3] sm:$0xff] }
 0xa20   : > { %v1790_v63 = vmul.f32 %v3690_v30, %v1774_v2  ;;  %v1782_v2 = vmul.f32 %v3626_v41, %v3265_v11  ;;  %v1781_v11 = vmul.f32 %v3634_v44, %v3269_v14  ;;  %v1776_v14 = vmul.f32 %v3614_v39, %v3297_v46 }
 0xa22   : > { %1813 = vrot.lane.b32.xlu0 %v1790_v63, %s4069_s21 }
 0xa25   : > { %v1728_v9 = vpop.permute.xlu2 %1727 }
 0xa26   : > { %v1752_v5 = vpop.permute.xlu0 %1751 }
 0xa27   : > { %v1771_v47 = vsel %vm759_vm8, %v1728_v9, %v1752_v5  ;;  %v1780_v9 = vmul.f32 %v3643_v1, %v3274_v19  ;;  %v1777_v19 = vmul.f32 %v3654_v62, %v3293_v40 }
 0xa28   : > { %v1787_v37 = vmul.f32 %v3698_v61, %v1771_v47 }
 0xa2a   : > { %1807 = vrot.lane.b32.xlu0 %v1787_v37, %s4069_s21 }
 0xa2d   : > { %v1750_v22 = vpop.permute.xlu2 %1749 }
 0xa2f   : > { %v1732_v4 = vpop.permute.xlu1 %1731 }
 0xa30   : > { %v1773_v56 = vsel %vm759_vm8, %v1732_v4, %v1756_v57  ;;  %v1779_v4 = vmul.f32 %v3630_v45, %v3267_v12  ;;  %v1778_v12 = vmul.f32 %v3657_v52, %v3281_v29  ;;  %v1775_v29 = vmul.f32 %v3610_v43, %v3305_v51 }
 0xa31   : > { %v1789_v3 = vmul.f32 %v3706_v17, %v1773_v56 }
 0xa33   : > { %1811 = vrot.lane.b32.xlu1 %v1789_v3, %s4069_s21 }
 0xa35   : > { %v1722_v21 = vpop.permute.xlu2 %1721 }
 0xa37   : > { %v1754_v6 = vpop.permute.xlu1 %1753  ;;  %v1730_v60 = vpop.permute.xlu0 %1729 }
 0xa38   : > { %v1772_v7 = vsel %vm759_vm8, %v1730_v60, %v1754_v6 }
 0xa39   : > { %v1788_v15 = vmul.f32 %v3714_v13, %v1772_v7 }
 0xa3b   : > { %1809 = vrot.lane.b32.xlu2 %v1788_v15, %s4069_s21 }
 0xa3d   : > { %v1744_v36 = vpop.permute.xlu2 %1743 }
 0xa3f   : > { %v1726_v58 = vpop.permute.xlu1 %1725  ;;  %v1724_v8 = vpop.permute.xlu0 %1723 }
 0xa40   : > { %v1770_v16 = vsel %vm759_vm8, %v1726_v58, %v1750_v22 }
 0xa41   : > { %v1786_v20 = vmul.f32 %v3722_v18, %v1770_v16 }
 0xa43   : > { %1805 = vrot.lane.b32.xlu1 %v1786_v20, %s4069_s21 }
 0xa47   : > { %v1748_v23 = vpop.permute.xlu1 %1747  ;;  %v1746_v24 = vpop.permute.xlu0 %1745 }
 0xa48   : > { %v1769_v26 = vsel %vm759_vm8, %v1724_v8, %v1748_v23  ;;  %v1768_v31 = vsel %vm759_vm8, %v1722_v21, %v1746_v24  ;;  %v2900_v24 = vld [vmem:[%s4044_s2] sm:$0xff] }
 0xa49   : > { %v1785_v34 = vmul.f32 %v3731_v32, %v1769_v26  ;;  %v1784_v50 = vmul.f32 %v3737_v35, %v1768_v31  ;;  %v1695_v26 = vmul.f32 %v2900_v24, %v3610_v43 }
 0xa4b   : > { %1803 = vrot.lane.b32.xlu2 %v1785_v34, %s4069_s21  ;;  %1801 = vrot.lane.b32.xlu0 %v1784_v50, %s4069_s21 }
 0xa4f   : > { %v1720_v54 = vpop.permute.xlu1 %1719 }
 0xa50   : > { %v1767_v57 = vsel %vm759_vm8, %v1720_v54, %v1744_v36 }
 0xa51   : > { %v1783_v27 = vmul.f32 %v3746_v59, %v1767_v57 }
 0xa53   : > { %1799 = vrot.lane.b32.xlu1 %v1783_v27, %s4069_s21 }
 0xa94   : > { %v1814_v63 = vpop.permute.xlu0 %1813 }
 0xa95   : > { %v1830_v5 = vadd.f32 %v1814_v63, %v1782_v2  ;;  %v1810_v47 = vpop.permute.xlu2 %1809 }
 0xa96   : > { %v1828_v37 = vadd.f32 %v1810_v47, %v1780_v9 }
 0xa97   : > { %1873 = vrot.lane.b32.xlu2 %v1830_v5, %s4069_s21 }
 0xa98   : > { %1869 = vrot.lane.b32.xlu1 %v1828_v37, %s4069_s21 }
 0xa9c   : > { %v1808_v56 = vpop.permute.xlu0 %1807 }
 0xa9d   : > { %v1827_v3 = vadd.f32 %v1808_v56, %v1779_v4 }
 0xa9f   : > { %1867 = vrot.lane.b32.xlu2 %v1827_v3, %s4069_s21 }
 0xaa5   : > { %v1812_v6 = vpop.permute.xlu1 %1811  ;;  %v1804_v60 = vpop.permute.xlu2 %1803 }
 0xaa6   : > { %v1829_v7 = vadd.f32 %v1812_v6, %v1781_v11  ;;  %v1825_v15 = vadd.f32 %v1804_v60, %v1777_v19 }
 0xaa8   : > { %1871 = vrot.lane.b32.xlu0 %v1829_v7, %s4069_s21  ;;  %1863 = vrot.lane.b32.xlu1 %v1825_v15, %s4069_s21 }
 0xab0   : > { %1663 = vrot.lane.b32.xlu1 %v3610_v43, %s4070_s24 }
 0xab5   : > { %v1806_v22 = vpop.permute.xlu1 %1805 }
 0xab6   : > { %v1826_v58 = vadd.f32 %v1806_v22, %v1778_v12 }
 0xab8   : > { %1865 = vrot.lane.b32.xlu0 %v1826_v58, %s4069_s21  ;;  %1665 = vrot.lane.b32.xlu1 %v3614_v39, %s4070_s24 }
 0xabd   : > { %v1802_v40 = vpop.permute.xlu0 %1801 }
 0xabe   : > { %v1824_v8 = vadd.f32 %v1802_v40, %v1776_v14 }
 0xac0   : > { %1639 = vrot.lane.b32.xlu0 %v1623_v0, %s4071_s15  ;;  %1861 = vrot.lane.b32.xlu2 %v1824_v8, %s4069_s21 }
 0xac1   : > { %1645 = vrot.lane.b32.xlu1 %v1626_v10, %s4071_s15 }
 0xac5   : > { %v1800_v16 = vpop.permute.xlu1 %1799 }
 0xac6   : > { %v1823_v20 = vadd.f32 %v1800_v16, %v1775_v29 }
 0xac8   : > { %1641 = vrot.lane.b32.xlu0 %v1624_v38, %s4071_s15  ;;  %1859 = vrot.lane.b32.xlu2 %v1823_v20, %s4069_s21 }
 0xac9   : > { %1671 = vrot.lane.b32.xlu1 %v3630_v45, %s4070_s24 }
 0xad0   : > { %1667 = vrot.lane.b32.xlu0 %v3654_v62, %s4070_s24  ;;  %1643 = vrot.lane.b32.xlu2 %v1625_v53, %s4071_s15 }
 0xad1   : > { %1651 = vrot.lane.b32.xlu1 %v1629_v55, %s4071_s15 }
 0xad8   : > { %1647 = vrot.lane.b32.xlu0 %v1627_v42, %s4071_s15  ;;  %1669 = vrot.lane.b32.xlu2 %v3657_v52, %s4070_s24 }
 0xad9   : > { %1677 = vrot.lane.b32.xlu1 %v3626_v41, %s4070_s24 }
 0xae0   : > { %1673 = vrot.lane.b32.xlu0 %v3643_v1, %s4070_s24  ;;  %1649 = vrot.lane.b32.xlu2 %v1628_v33, %s4071_s15 }
 0xae8   : > { %1653 = vrot.lane.b32.xlu0 %v1630_v49, %s4071_s15  ;;  %1675 = vrot.lane.b32.xlu2 %v3634_v44, %s4070_s24 }
 0xaf1   : > { %v1874_v46 = vpop.permute.xlu2 %1873 }
 0xaf2   : > { %2654 = vmatpush.xpose.msk.msrb.mxu3 %vm980_vm9, %v1874_v46 }
 0xaf9   : > { %v1868_v42 = vpop.permute.xlu2 %1867 }
 0xb0a   : > { %v1870_v55 = vpop.permute.xlu1 %1869 }
 0xb1a   : > { %v1872_v51 = vpop.permute.xlu0 %1871  ;;  %v1864_v33 = vpop.permute.xlu1 %1863 }
 0xb1b   : > { %2655 = vmatpush.xpose.msk.msrb.mxu3 %vm980_vm9, %v1872_v51  ;;  %v1862_v10 = vpop.permute.xlu2 %1861 }
 0xb1f   : > { %2656 = vmatpush.xpose.msk.msrb.mxu3 %vm980_vm9, %v1870_v55 }
 0xb22   : > { %v1664_v49 = vpop.permute.xlu1 %1663 }
 0xb23   : > { %2657 = vmatpush.xpose.msk.msrb.mxu3 %vm980_vm9, %v1868_v42  ;;  %v1860_v38 = vpop.permute.xlu2 %1859 }
 0xb2a   : > { %v1866_v53 = vpop.permute.xlu0 %1865  ;;  %v1666_v34 = vpop.permute.xlu1 %1665 }
 0xb2b   : > { %2658 = vmatpush.xpose.msk.msrb.mxu3 %vm980_vm9, %v1866_v53  ;;  %v1644_v54 = vpop.permute.xlu2 %1643 }
 0xb2f   : > { %2659 = vmatpush.xpose.msk.msrb.mxu3 %vm980_vm9, %v1864_v33 }
 0xb32   : > { %v1640_v0 = vpop.permute.xlu0 %1639 }
 0xb33   : > { %v1687_v21 = vsel %vm759_vm8, %v1640_v0, %v1664_v49  ;;  %2660 = vmatpush.xpose.msk.msrb.mxu3 %vm980_vm9, %v1862_v10  ;;  %v1646_v5 = vpop.permute.xlu1 %1645  ;;  %v1670_v47 = vpop.permute.xlu2 %1669  ;;  %v2908_v49 = vld [vmem:[%s3397_s20] sm:$0xff] }
 0xb34   : > { %v1703_v23 = vmul.f32 %v3746_v59, %v1687_v21  ;;  %v2901_v59 = vld [vmem:[%s4044_s2 + $0x8] sm:$0xff]  ;;  %v1690_v56 = vsel %vm759_vm8, %v1646_v5, %v1670_v47 }
 0xb35   : > { %v1696_v27 = vmul.f32 %v2901_v59, %v3614_v39  ;;  %v1706_v39 = vmul.f32 %v3722_v18, %v1690_v56  ;;  %v2904_v18 = vld [vmem:[%s4044_s2 + $0x20] sm:$0xff]  ;;  %v2911_v59 = vld [vmem:[%s3397_s20 + $0x18] sm:$0xff]  ;;  %v2913_v56 = vld [vmem:[%s3397_s20 + $0x28] sm:$0xff] }
 0xb36   : > { %v1711_v31 = vadd.f32 %v1703_v23, %v1695_v26  ;;  %v1699_v12 = vmul.f32 %v2904_v18, %v3630_v45  ;;  %v2909_v23 = vld [vmem:[%s3397_s20 + $0x8] sm:$0xff] }
 0xb37   : > { %2661 = vmatpush.xpose.msk.msrb.mxu3 %vm980_vm9, %v1860_v38 }
 0xb3a   : > { %v1642_v50 = vpop.permute.xlu0 %1641  ;;  %2662 = vmatmul.msk.f32.vlgmr.msrb.gmra.mxu3 %vm980_vm9, %v1711_v31 }
 0xb3b   : > { %v1688_v36 = vsel %vm759_vm8, %v1642_v50, %v1666_v34  ;;  %v1672_v19 = vpop.permute.xlu1 %1671  ;;  %v2910_v34 = vld [vmem:[%s3397_s20 + $0x10] sm:$0xff] }
 0xb3c   : > { %v1704_v57 = vmul.f32 %v3737_v35, %v1688_v36  ;;  %v2902_v35 = vld [vmem:[%s4044_s2 + $0x10] sm:$0xff] }
 0xb3d   : > { %v1697_v37 = vmul.f32 %v2902_v35, %v3654_v62  ;;  %v1650_v62 = vpop.permute.xlu2 %1649  ;;  %v3891_v35 = vpop.f32.mrf.mxu0 }
 0xb3e   : > { %v1712_v2 = vadd.f32 %v1704_v57, %v1696_v27 }
 0xb42   : > { %v1668_v43 = vpop.permute.xlu0 %1667  ;;  %2663 = vmatmul.msk.f32.gmra.mxu3 %vm980_vm9, %v1712_v2 }
 0xb43   : > { %v1689_v63 = vsel %vm759_vm8, %v1644_v54, %v1668_v43  ;;  %v1652_v14 = vpop.permute.xlu1 %1651 }
 0xb44   : > { %v1705_v9 = vmul.f32 %v3731_v32, %v1689_v63  ;;  %v2903_v32 = vld [vmem:[%s4044_s2 + $0x18] sm:$0xff] }
 0xb45   : > { %v1698_v11 = vmul.f32 %v2903_v32, %v3657_v52  ;;  %v1676_v40 = vpop.permute.xlu2 %1675 }
 0xb46   : > { %v1713_v4 = vadd.f32 %v1705_v9, %v1697_v37  ;;  %v1693_v16 = vsel %vm759_vm8, %v1652_v14, %v1676_v40  ;;  %v2912_v9 = vld [vmem:[%s3397_s20 + $0x20] sm:$0xff] }
 0xb47   : > { %v1714_v6 = vadd.f32 %v1706_v39, %v1698_v11  ;;  %v1709_v45 = vmul.f32 %v3706_v17, %v1693_v16  ;;  %v2907_v17 = vld [vmem:[%s4044_s2 + $0x38] sm:$0xff]  ;;  %v3895_v11 = vpop.f32.mrf.mxu0 }
 0xb48   : > { %v1702_v33 = vmul.f32 %v2907_v17, %v3626_v41 }
 0xb4a   : > { %2664 = vmatmul.msk.f32.gmra.mxu3 %vm980_vm9, %v1713_v4  ;;  %v1648_v3 = vpop.permute.xlu0 %1647 }
 0xb4b   : > { %v1691_v60 = vsel %vm759_vm8, %v1648_v3, %v1672_v19  ;;  %v1678_v51 = vpop.permute.xlu1 %1677 }
 0xb4c   : > { %v1707_v7 = vmul.f32 %v3698_v61, %v1691_v60  ;;  %v2905_v61 = vld [vmem:[%s4044_s2 + $0x28] sm:$0xff] }
 0xb4d   : > { %v1700_v8 = vmul.f32 %v2905_v61, %v3643_v1 }
 0xb4e   : > { %v1715_v22 = vadd.f32 %v1707_v7, %v1699_v12  ;;  %v2915_v12 = vld [vmem:[%s3397_s20 + $0x38] sm:$0xff] }
 0xb52   : > { %2665 = vmatmul.msk.f32.gmra.mxu3 %vm980_vm9, %v1714_v6  ;;  %v1674_v15 = vpop.permute.xlu0 %1673  ;;  %v2914_v6 = vld [vmem:[%s3397_s20 + $0x30] sm:$0xff] }
 0xb53   : > { %v1692_v58 = vsel %vm759_vm8, %v1650_v62, %v1674_v15  ;;  %v2770_v62 = vpack.i.bf16 %v3891_v35, %v3895_v11 }
 0xb54   : > { %v1708_v52 = vmul.f32 %v3714_v13, %v1692_v58  ;;  %v2906_v13 = vld [vmem:[%s4044_s2 + $0x30] sm:$0xff] }
 0xb55   : > { %v1701_v46 = vmul.f32 %v2906_v13, %v3634_v44 }
 0xb56   : > { %v1716_v29 = vadd.f32 %v1708_v52, %v1700_v8 }
 0xb57   : > { %v1717_v55 = vadd.f32 %v1709_v45, %v1701_v46 }
 0xb5a   : > { %2666 = vmatmul.msk.f32.gmra.mxu3 %vm980_vm9, %v1715_v22  ;;  %v1654_v20 = vpop.permute.xlu0 %1653 }
 0xb5b   : > { %v1694_v1 = vsel %vm759_vm8, %v1654_v20, %v1678_v51 }
 0xb5c   : > { %v1710_v42 = vmul.f32 %v3690_v30, %v1694_v1 }
 0xb5e   : > { %v1718_v10 = vadd.f32 %v1710_v42, %v1702_v33 }
 0xb62   : > { %2667 = vmatmul.msk.f32.gmra.mxu3 %vm980_vm9, %v1716_v29 }
 0xb6a   : > { %2668 = vmatmul.msk.f32.gmra.mxu3 %vm980_vm9, %v1717_v55 }
 0xb72   : > { %2669 = vmatmul.msk.f32.gmra.mxu3 %vm980_vm9, %v1718_v10 }
 0xbbd   : > { %v1932_v44 = vpop.f32.mrf.mxu3 }
 0xbbe   : > { %v1956_v53 = vmul.f32 0.25, %v1932_v44 }
 0xbc0   : > { %v1964_v38 = vadd.f32 %v2908_v49, %v1956_v53 }
 0xbc2   : > { %v1972_v0 = vsel %vm562_vm0, %v1964_v38, -inf }
 0xbc3   : > { %1973 = vmax.xlane.f32.xlu2 %v1972_v0 }
 0xbc5   : > { %v1935_v21 = vpop.f32.mrf.mxu3 }
 0xbc6   : > { %v1957_v30 = vmul.f32 0.25, %v1935_v21 }
 0xbc8   : > { %v1965_v24 = vadd.f32 %v2909_v23, %v1957_v30 }
 0xbca   : > { %v1975_v26 = vsel %vm562_vm0, %v1965_v24, -inf }
 0xbcb   : > { %1976 = vmax.xlane.f32.xlu0 %v1975_v26 }
 0xbcd   : > { %v1938_v41 = vpop.f32.mrf.mxu3 }
 0xbce   : > { %v1958_v31 = vmul.f32 0.25, %v1938_v41 }
 0xbd0   : > { %v3883_v50 = vadd.f32 %v2910_v34, %v1958_v31 }
 0xbd2   : > { %v1978_v36 = vsel %vm562_vm0, %v3883_v50, -inf }
 0xbd3   : > { %1979 = vmax.xlane.f32.xlu1 %v1978_v36 }
 0xbd5   : > { %v1941_v54 = vpop.f32.mrf.mxu3 }
 0xbd6   : > { %v1959_v57 = vmul.f32 0.25, %v1941_v54 }
 0xbd8   : > { %v1967_v27 = vadd.f32 %v2911_v59, %v1959_v57 }
 0xbda   : > { %v1981_v2 = vsel %vm562_vm0, %v1967_v27, -inf }
 0xbdb   : > { %1982 = vmax.xlane.f32.xlu2 %v1981_v2 }
 0xbdd   : > { %v1944_v43 = vpop.f32.mrf.mxu3 }
 0xbde   : > { %v1960_v63 = vmul.f32 0.25, %v1944_v43 }
 0xbe0   : > { %v1968_v5 = vadd.f32 %v2912_v9, %v1960_v63 }
 0xbe2   : > { %v1984_v47 = vsel %vm562_vm0, %v1968_v5, -inf }
 0xbe3   : > { %1985 = vmax.xlane.f32.xlu0 %v1984_v47 }
 0xbe5   : > { %v1947_v37 = vpop.f32.mrf.mxu3 }
 0xbe6   : > { %v1961_v4 = vmul.f32 0.25, %v1947_v37 }
 0xbe8   : > { %v1969_v39 = vadd.f32 %v2913_v56, %v1961_v4 }
 0xbea   : > { %v1987_v3 = vsel %vm562_vm0, %v1969_v39, -inf }
 0xbeb   : > { %1988 = vmax.xlane.f32.xlu1 %v1987_v3 }
 0xbed   : > { %v1950_v32 = vpop.f32.mrf.mxu3 }
 0xbee   : > { %v1962_v19 = vmul.f32 0.25, %v1950_v32 }
 0xbf0   : > { %v1970_v60 = vadd.f32 %v2914_v6, %v1962_v19 }
 0xbf2   : > { %v1990_v7 = vsel %vm562_vm0, %v1970_v60, -inf }
 0xbf3   : > { %1991 = vmax.xlane.f32.xlu0 %v1990_v7  ;;  %2771 = vrot.lane.b32.xlu2 %v2770_v62, %s2927_s14  ;;  %s4074_s14 = smov 48  }
 0xbf5   : > { %v1953_v15 = vpop.f32.mrf.mxu3 }
 0xbf6   : > { %v1963_v18 = vmul.f32 0.25, %v1953_v15 }
 0xbf8   : > { %v3904_v22 = vadd.f32 %v2915_v12, %v1963_v18 }
 0xbfa   : > { %v1993_v58 = vsel %vm562_vm0, %v3904_v22, -inf }
 0xc04   : > { %2776 = vrot.lane.b32.xlu1 %v2770_v62, %s2926_s13  ;;  %s4073_s13 = smov 32  }
 0xc1c   : > { %1994 = vmax.xlane.f32.xlu2 %v1993_v58 }
 0xc36   : > { %v1974_v52 = vpop.xlane.xlu2 %1973 }
 0xc37   : > { %v1996_v14 = vsub.f32 %v1964_v38, %v1974_v52 }
 0xc39   : > { %v2004_v40 = vmul.f32 1.442695, %v1996_v14 }
 0xc3b   : > { %2844 = vpow2.f32 %v2004_v40 }
 0xc3e   : > { %v1977_v61 = vpop.xlane.xlu0 %1976 }
 0xc3f   : > { %v1997_v8 = vsub.f32 %v1965_v24, %v1977_v61 }
 0xc41   : > { %v3908_v29 = vpop.eup %2844  ;;  %v2006_v16 = vmul.f32 1.442695, %v1997_v8 }
 0xc42   : > { %v2020_v45 = vsel %vm562_vm0, %v3908_v29, 0.0 }
 0xc43   : > { %2846 = vpow2.f32 %v2006_v16  ;;  %2021 = vadd.xlane.f32.xlu0 %v2020_v45 }
 0xc46   : > { %v1980_v1 = vpop.xlane.xlu1 %1979 }
 0xc47   : > { %v1998_v54 = vsub.f32 %v3883_v50, %v1980_v1 }
 0xc49   : > { %v3912_v20 = vpop.eup %2846 }
 0xc4a   : > { %v2023_v13 = vsel %vm562_vm0, %v3912_v20, 0.0 }
 0xc4b   : > { %2024 = vadd.xlane.f32.xlu1 %v2023_v13 }
 0xc4e   : > { %v1983_v46 = vpop.xlane.xlu2 %1982 }
 0xc4f   : > { %v1999_v51 = vsub.f32 %v1967_v27, %v1983_v46  ;;  %v2008_v27 = vmul.f32 1.442695, %v1998_v54 }
 0xc51   : > { %v2010_v55 = vmul.f32 1.442695, %v1999_v51 }
 0xc53   : > { %2848 = vpow2.f32 %v2010_v55 }
 0xc56   : > { %v1986_v42 = vpop.xlane.xlu0 %1985  ;;  %v2772_v17 = vpop.permute.xlu2 %2771 }
 0xc57   : > { %v2000_v33 = vsub.f32 %v1968_v5, %v1986_v42  ;;  %v2773_v10 = vunpack.i.l.bf16 %v2772_v17  ;;  %2781 = vrot.lane.b32.xlu0 %v2770_v62, %s2925_s12  ;;  %v2774_v49 = vunpack.i.h.bf16 %v2772_v17  ;;  %s4072_s12 = smov 16  }
 0xc59   : > { %v3917_v44 = vpop.eup %2848  ;;  %v2012_v53 = vmul.f32 1.442695, %v2000_v33  ;;  %2092 = vmatpush.msrb.mxu1 %v2773_v10 }
 0xc5a   : > { %v2029_v38 = vsel %vm562_vm0, %v3917_v44, 0.0 }
 0xc5b   : > { %2850 = vpow2.f32 %v2012_v53  ;;  %2030 = vadd.xlane.f32.xlu2 %v2029_v38  ;;  %2093 = vmatpush.msrb.mxu1 %v2774_v49  ;;  %v2685_v49 = vld [vmem:[%s3484_s16 + $0x78] sm:$0xff]  ;;  %v2684_v38 = vld [vmem:[%s3484_s16 + $0x70] sm:$0xff] }
 0xc5c   : > { %2178 = vmatpush.msrb.mxu0 %v2685_v49 }
 0xc5e   : > { %v1989_v0 = vpop.xlane.xlu1 %1988  ;;  %2179 = vmatpush.msrb.mxu0 %v2684_v38 }
 0xc5f   : > { %v2001_v21 = vsub.f32 %v1969_v39, %v1989_v0  ;;  %v2683_v0 = vld [vmem:[%s3484_s16 + $0x68] sm:$0xff] }
 0xc60   : > { %2180 = vmatpush.msrb.mxu0 %v2683_v0 }
 0xc61   : > { %v3921_v30 = vpop.eup %2850  ;;  %v2014_v23 = vmul.f32 1.442695, %v2001_v21  ;;  %v2682_v21 = vld [vmem:[%s3484_s16 + $0x60] sm:$0xff] }
 0xc62   : > { %v2032_v24 = vsel %vm562_vm0, %v3921_v30, 0.0  ;;  %2181 = vmatpush.msrb.mxu0 %v2682_v21 }
 0xc63   : > { %2852 = vpow2.f32 %v2014_v23  ;;  %2033 = vadd.xlane.f32.xlu2 %v2032_v24  ;;  %v2680_v23 = vld [vmem:[%s3484_s16 + $0x50] sm:$0xff]  ;;  %v2679_v24 = vld [vmem:[%s3484_s16 + $0x48] sm:$0xff] }
 0xc66   : > { %v1992_v26 = vpop.xlane.xlu0 %1991 }
 0xc67   : > { %v2002_v41 = vsub.f32 %v1970_v60, %v1992_v26  ;;  %v2678_v26 = vld [vmem:[%s3484_s16 + $0x40] sm:$0xff] }
 0xc69   : > { %v3925_v31 = vpop.eup %2852  ;;  %v2016_v34 = vmul.f32 1.442695, %v2002_v41 }
 0xc6a   : > { %v2035_v36 = vsel %vm562_vm0, %v3925_v31, 0.0 }
 0xc6b   : > { %2854 = vpow2.f32 %v2016_v34  ;;  %2036 = vadd.xlane.f32.xlu1 %v2035_v36 }
 0xc6c   : > { %2856 = vpow2.f32 %v2008_v27 }
 0xc71   : > { %v2855_v57 = vpop.eup %2854 }
 0xc72   : > { %v2038_v59 = vsel %vm562_vm0, %v2855_v57, 0.0  ;;  %v2857_v9 = vpop.eup %2856 }
 0xc73   : > { %2039 = vadd.xlane.f32.xlu2 %v2038_v59  ;;  %v2026_v5 = vsel %vm562_vm0, %v2857_v9, 0.0 }
 0xc76   : > { %v2777_v2 = vpop.permute.xlu1 %2776 }
 0xc77   : > { %v2778_v43 = vunpack.i.l.bf16 %v2777_v2  ;;  %v2779_v63 = vunpack.i.h.bf16 %v2777_v2 }
 0xc79   : > { %2094 = vmatpush.msrb.mxu1 %v2778_v43 }
 0xc7b   : > { %2095 = vmatpush.msrb.mxu1 %v2779_v63 }
 0xc81   : > { %2027 = vadd.xlane.f32.xlu0 %v2026_v5  ;;  %v2703_v5 = vld [vmem:[%s3524_s28 + $0xf0] sm:$0xff] }
 0xc82   : > { %2267 = vmatpush.msrb.mxu2 %v2703_v5  ;;  %v2712_v5 = vld [vmem:[%s3555_s19 + $0x88] sm:$0xff] }
 0xc8f   : > { %v1995_v47 = vpop.xlane.xlu2 %1994 }
 0xc90   : > { %v2003_v37 = vsub.f32 %v3904_v22, %v1995_v47  ;;  %v2701_v47 = vld [vmem:[%s3524_s28 + $0xe0] sm:$0xff] }
 0xc91   : > { %2268 = vmatpush.msrb.mxu2 %v2701_v47 }
 0xc92   : > { %v2018_v4 = vmul.f32 1.442695, %v2003_v37 }
 0xc94   : > { %2858 = vpow2.f32 %v2018_v4 }
 0xc9a   : > { %v2859_v50 = vpop.eup %2858 }
 0xc9b   : > { %v2041_v56 = vsel %vm562_vm0, %v2859_v50, 0.0 }
 0xc9c   : > { %2042 = vadd.xlane.f32.xlu0 %v2041_v56 }
 0xcb6   : > { %v2022_v39 = vpop.xlane.xlu0 %2021 }
 0xcb7   : > { %2860 = vrcp.f32 %v2022_v39 }
 0xcbd   : > { %v2861_v60 = vpop.eup %2860 }
 0xcbe   : > { %v2025_v6 = vpop.xlane.xlu1 %2024  ;;  %v2052_v62 = vmul.f32 %v2861_v60, %v3908_v29  ;;  %v2699_v60 = vld [vmem:[%s3524_s28 + $0xd0] sm:$0xff] }
 0xcbf   : > { %2862 = vrcp.f32 %v2025_v6  ;;  %v2702_v6 = vld [vmem:[%s3524_s28 + $0xe8] sm:$0xff]  ;;  %2269 = vmatpush.msrb.mxu2 %v2699_v60 }
 0xcc5   : > { %v2863_v7 = vpop.eup %2862 }
 0xcc6   : > { %v2053_v15 = vmul.f32 %v2863_v7, %v3912_v20  ;;  %v2698_v7 = vld [vmem:[%s3524_s28 + $0xc8] sm:$0xff] }
 0xcc9   : > { %v2782_v3 = vpop.permute.xlu0 %2781 }
 0xcca   : > { %v2783_v32 = vunpack.i.l.bf16 %v2782_v3  ;;  %v2784_v19 = vunpack.i.h.bf16 %v2782_v3 }
 0xccc   : > { %2096 = vmatpush.msrb.mxu1 %v2783_v32 }
 0xcce   : > { %2097 = vmatpush.msrb.mxu1 %v2784_v19  ;;  %v2031_v12 = vpop.xlane.xlu2 %2030  ;;  %v2704_v19 = vld [vmem:[%s3524_s28 + $0xf8] sm:$0xff] }
 0xcd0   : > { %2098 = vmatpush.msrb.mxu1 %v3895_v11 }
 0xcd2   : > { %2099 = vmatpush.msrb.mxu1 %v3891_v35 }
 0xcd3   : > { %2670 = vmatmul.msk.f32.vlgmr.msrb.gmra.mxu1 %vm562_vm0, %v2052_v62  ;;  %v2700_v62 = vld [vmem:[%s3524_s28 + $0xd8] sm:$0xff] }
 0xcd6   : > { %v2034_v11 = vpop.xlane.xlu2 %2033 }
 0xcdb   : > { %2671 = vmatmul.msk.f32.gmra.mxu1 %vm562_vm0, %v2053_v15  ;;  %v2695_v15 = vld [vmem:[%s3524_s28 + $0xb0] sm:$0xff] }
 0xcde   : > { %v2037_v14 = vpop.xlane.xlu1 %2036 }
 0xce6   : > { %v2040_v8 = vpop.xlane.xlu2 %2039 }
 0xcf4   : > { %v2028_v18 = vpop.xlane.xlu0 %2027 }
 0xcf5   : > { %2864 = vrcp.f32 %v2028_v18  ;;  %v2696_v18 = vld [vmem:[%s3524_s28 + $0xb8] sm:$0xff] }
 0xcf6   : > { %2866 = vrcp.f32 %v2031_v12  ;;  %v2693_v12 = vld [vmem:[%s3524_s28 + $0xa0] sm:$0xff] }
 0xcf7   : > { %2868 = vrcp.f32 %v2034_v11  ;;  %v2692_v11 = vld [vmem:[%s3524_s28 + $0x98] sm:$0xff] }
 0xcf8   : > { %2870 = vrcp.f32 %v2037_v14 }
 0xcf9   : > { %2872 = vrcp.f32 %v2040_v8 }
 0xcfb   : > { %v2865_v22 = vpop.eup %2864 }
 0xcfc   : > { %v2054_v58 = vmul.f32 %v2865_v22, %v2857_v9  ;;  %v2867_v52 = vpop.eup %2866  ;;  %v2694_v22 = vld [vmem:[%s3524_s28 + $0xa8] sm:$0xff] }
 0xcfd   : > { %v2055_v35 = vmul.f32 %v2867_v52, %v3917_v44  ;;  %v2869_v40 = vpop.eup %2868  ;;  %v2689_v52 = vld [vmem:[%s3524_s28 + $0x80] sm:$0xff] }
 0xcfe   : > { %2672 = vmatmul.msk.f32.gmra.mxu1 %vm562_vm0, %v2054_v58  ;;  %v2056_v61 = vmul.f32 %v2869_v40, %v3921_v30  ;;  %v2871_v29 = vpop.eup %2870  ;;  %v2681_v30 = vld [vmem:[%s3484_s16 + $0x58] sm:$0xff]  ;;  %v2691_v58 = vld [vmem:[%s3524_s28 + $0x90] sm:$0xff] }
 0xcff   : > { %v2057_v16 = vmul.f32 %v2871_v29, %v3925_v31  ;;  %v2873_v20 = vpop.eup %2872  ;;  %2182 = vmatpush.msrb.mxu0 %v2681_v30 }
 0xd00   : > { %v2058_v13 = vmul.f32 %v2873_v20, %v2855_v57 }
 0xd01   : > { %2183 = vmatpush.msrb.mxu0 %v2680_v23 }
 0xd03   : > { %2184 = vmatpush.msrb.mxu0 %v2679_v24  ;;  %v2726_v24 = vld [vmem:[%s3555_s19 + $0xf8] sm:$0xff] }
 0xd05   : > { %2185 = vmatpush.msrb.mxu0 %v2678_v26  ;;  %v2725_v26 = vld [vmem:[%s3555_s19 + $0xf0] sm:$0xff] }
 0xd06   : > { %2673 = vmatmul.msk.f32.gmra.mxu1 %vm562_vm0, %v2055_v35  ;;  %v2690_v35 = vld [vmem:[%s3524_s28 + $0x88] sm:$0xff] }
 0xd07   : > { %2290 = vmatpush.msra.mxu0 %v2704_v19 }
 0xd09   : > { %2291 = vmatpush.msra.mxu0 %v2702_v6 }
 0xd0b   : > { %2292 = vmatpush.msra.mxu0 %v2700_v62 }
 0xd0d   : > { %2293 = vmatpush.msra.mxu0 %v2698_v7 }
 0xd0e   : > { %2674 = vmatmul.msk.f32.gmra.mxu1 %vm562_vm0, %v2056_v61 }
 0xd0f   : > { %v2043_v45 = vpop.xlane.xlu0 %2042  ;;  %2294 = vmatpush.msra.mxu0 %v2696_v18 }
 0xd10   : > { %2874 = vrcp.f32 %v2043_v45 }
 0xd11   : > { %2295 = vmatpush.msra.mxu0 %v2694_v22 }
 0xd13   : > { %2296 = vmatpush.msra.mxu0 %v2692_v11 }
 0xd15   : > { %2297 = vmatpush.msra.mxu0 %v2690_v35 }
 0xd16   : > { %2675 = vmatmul.msk.f32.gmra.mxu1 %vm562_vm0, %v2057_v16  ;;  %v2875_v46 = vpop.eup %2874 }
 0xd17   : > { %v2059_v51 = vmul.f32 %v2875_v46, %v2859_v50 }
 0xd1e   : > { %2676 = vmatmul.msk.f32.gmra.mxu1 %vm562_vm0, %v2058_v13 }
 0xd26   : > { %2677 = vmatmul.msk.f32.gmra.mxu1 %vm562_vm0, %v2059_v51 }
 0xd50   : > { %v2101_v55 = vpop.f32.mrf.mxu1 }
 0xd58   : > { %v2104_v1 = vpop.f32.mrf.mxu1 }
 0xd7b   : > { %v2107_v42 = vpop.f32.mrf.mxu1 }
 0xd7c   : > { %2127 = vrot.lane.b32.xlu1 %v2107_v42, %s4072_s12 }
 0xd83   : > { %v2110_v17 = vpop.f32.mrf.mxu1 }
 0xd84   : > { %2129 = vrot.lane.b32.xlu1 %v2110_v17, %s4072_s12  ;;  %v2788_v17 = vld [vmem:[%s3518_s25 + $0x1] ss:$0 sm:$0xff] }
 0xd8b   : > { %v2113_v33 = vpop.f32.mrf.mxu1 }
 0xd8c   : > { %2135 = vrot.lane.b32.xlu2 %v2113_v33, %s4073_s13 }
 0xd93   : > { %v2116_v10 = vpop.f32.mrf.mxu1 }
 0xd9b   : > { %v2119_v44 = vpop.f32.mrf.mxu1 }
 0xd9c   : > { %2143 = vrot.lane.b32.xlu0 %v2119_v44, %s4074_s14 }
 0xda3   : > { %v2122_v53 = vpop.f32.mrf.mxu1 }
 0xda4   : > { %2137 = vrot.lane.b32.xlu0 %v2116_v10, %s4073_s13  ;;  %2145 = vrot.lane.b32.xlu2 %v2122_v53, %s4074_s14 }
 0xde6   : > { %v2136_v34 = vpop.permute.xlu2 %2135 }
 0xdee   : > { %v2128_v41 = vpop.permute.xlu1 %2127 }
 0xdef   : > { %v2149_v31 = vsel %vm980_vm9, %v2101_v55, %v2128_v41  ;;  %v2724_v41 = vld [vmem:[%s3555_s19 + $0xe8] sm:$0xff] }
 0xdf0   : > { %v2151_v36 = vsel %vm1257_vm10, %v2149_v31, %v2136_v34  ;;  %v2723_v31 = vld [vmem:[%s3555_s19 + $0xe0] sm:$0xff]  ;;  %v2722_v34 = vld [vmem:[%s3555_s19 + $0xd8] sm:$0xff] }
 0xdf6   : > { %v2130_v59 = vpop.permute.xlu1 %2129 }
 0xdf7   : > { %v2150_v27 = vsel %vm980_vm9, %v2104_v1, %v2130_v59  ;;  %v2718_v59 = vld [vmem:[%s3555_s19 + $0xb8] sm:$0xff] }
 0xdfe   : > { %v2146_v43 = vpop.permute.xlu2 %2145 }
 0xe0e   : > { %v2144_v54 = vpop.permute.xlu0 %2143 }
 0xe0f   : > { %v2153_v57 = vsel %vm1260_vm11, %v2151_v36, %v2144_v54  ;;  %v2721_v36 = vld [vmem:[%s3555_s19 + $0xd0] sm:$0xff]  ;;  %v2720_v54 = vld [vmem:[%s3555_s19 + $0xc8] sm:$0xff] }
 0xe10   : > { %2686 = vmatmul.msk.f32.vlgmr.msrb.gmra.mxu0 %vm562_vm0, %v2153_v57  ;;  %v2719_v57 = vld [vmem:[%s3555_s19 + $0xc0] sm:$0xff] }
 0xe16   : > { %v2138_v2 = vpop.permute.xlu0 %2137 }
 0xe17   : > { %v2152_v63 = vsel %vm1257_vm10, %v2150_v27, %v2138_v2  ;;  %v2717_v27 = vld [vmem:[%s3555_s19 + $0xb0] sm:$0xff]  ;;  %v2716_v2 = vld [vmem:[%s3555_s19 + $0xa8] sm:$0xff] }
 0xe18   : > { %v2154_v9 = vsel %vm1260_vm11, %v2152_v63, %v2146_v43  ;;  %v2715_v43 = vld [vmem:[%s3555_s19 + $0xa0] sm:$0xff]  ;;  %v2714_v63 = vld [vmem:[%s3555_s19 + $0x98] sm:$0xff] }
 0xe19   : > { %2687 = vmatmul.msk.f32.gmra.mxu0 %vm562_vm0, %v2154_v9  ;;  %v2713_v9 = vld [vmem:[%s3555_s19 + $0x90] sm:$0xff] }
 0xe8d   : > { %v2187_v37 = vpop.f32.mrf.mxu0 }
 0xe8e   : > { %v3974_v4 = vadd.f32 %v2187_v37, %v3574_v48  ;;  %v2711_v37 = vld [vmem:[%s3555_s19 + $0x80] sm:$0xff]  ;;  %s532_s19 = scalar_lea.vmem %s4053_s11, %s3025_s23 }
 0xe90   : > { %v2197_v50 = vmul.f32 %v3974_v4, %v3974_v4 }
 0xe92   : > { %v2199_v56 = vsel %vm562_vm0, %v2197_v50, 0.0 }
 0xe93   : > { %2200 = vadd.xlane.f32.xlu1 %v2199_v56 }
 0xe96   : > { %v2190_v39 = vpop.f32.mrf.mxu0 }
 0xe97   : > { %v3980_v3 = vadd.f32 %v2190_v39, %v3580_v25  ;;  %v2697_v25 = vld [vmem:[%s3524_s28 + $0xc0] sm:$0xff]  ;;  %s528_s28 = scalar_lea.vmem %s4052_s10, %s4076_s18 }
 0xe98   : > { %2270 = vmatpush.msrb.mxu2 %v2697_v25 }
 0xe99   : > { %v2198_v32 = vmul.f32 %v3980_v3, %v3980_v3 }
 0xe9a   : > { %2271 = vmatpush.msrb.mxu2 %v2695_v15 }
 0xe9b   : > { %v2202_v48 = vsel %vm562_vm0, %v2198_v32, 0.0 }
 0xe9c   : > { %2203 = vadd.xlane.f32.xlu0 %v2202_v48  ;;  %2272 = vmatpush.msrb.mxu2 %v2693_v12 }
 0xe9e   : > { %2273 = vmatpush.msrb.mxu2 %v2691_v58 }
 0xea0   : > { %2274 = vmatpush.msrb.mxu2 %v2689_v52 }
 0xea2   : > { %2364 = vmatpush.msra.mxu2 %v2726_v24 }
 0xea4   : > { %2365 = vmatpush.msra.mxu2 %v2725_v26 }
 0xea6   : > { %2366 = vmatpush.msra.mxu2 %v2724_v41 }
 0xea8   : > { %2367 = vmatpush.msra.mxu2 %v2723_v31 }
 0xeaa   : > { %2368 = vmatpush.msra.mxu2 %v2722_v34 }
 0xeac   : > { %2369 = vmatpush.msra.mxu2 %v2721_v36 }
 0xeae   : > { %2370 = vmatpush.msra.mxu2 %v2720_v54 }
 0xeb0   : > { %2371 = vmatpush.msra.mxu2 %v2719_v57  ;;  %v2789_v57 = vld [vmem:[%s528_s28] ss:$0 sm:$0xff] }
 0xeb2   : > { %2372 = vmatpush.msra.mxu2 %v2718_v59 }
 0xeb4   : > { %2373 = vmatpush.msra.mxu2 %v2717_v27 }
 0xeb6   : > { %2374 = vmatpush.msra.mxu2 %v2716_v2 }
 0xeb8   : > { %2375 = vmatpush.msra.mxu2 %v2715_v43 }
 0xeba   : > { %2376 = vmatpush.msra.mxu2 %v2714_v63 }
 0xebc   : > { %2377 = vmatpush.msra.mxu2 %v2713_v9 }
 0xebe   : > { %2378 = vmatpush.msra.mxu2 %v2712_v5 }
 0xec0   : > { %2379 = vmatpush.msra.mxu2 %v2711_v37 }
 0xf06   : > { %v2201_v14 = vpop.xlane.xlu1 %2200 }
 0xf07   : > { %v2205_v40 = vmul.f32 %v2201_v14, %v3058_v28 }
 0xf09   : > { %v2207_v61 = vadd.f32 1e-05, %v2205_v40 }
 0xf0b   : > { %2876 = vrsqrt.f32 %v2207_v61  ;;  %vm2215_vm9 = vweird.f32 %v2207_v61 }
 0xf0f   : > { %v2204_v8 = vpop.xlane.xlu0 %2203 }
 0xf10   : > { %v2206_v29 = vmul.f32 %v2204_v8, %v3058_v28 }
 0xf11   : > { %v2877_v16 = vpop.eup %2876 }
 0xf12   : > { %v2210_v45 = vmul.f32 %v2877_v16, %v2207_v61  ;;  %v2208_v20 = vadd.f32 1e-05, %v2206_v29  ;;  %vm2216_vm8 = vweird.f32 %v2877_v16 }
 0xf13   : > { %vm2217_vm10 = vmor %vm2215_vm9, %vm2216_vm8 }
 0xf14   : > { %v2211_v13 = vmul.f32 %v2877_v16, %v2210_v45  ;;  %2878 = vrsqrt.f32 %v2208_v20  ;;  %vm2225_vm6 = vweird.f32 %v2208_v20 }
 0xf16   : > { %v2212_v46 = vmul.f32 0.5, %v2211_v13 }
 0xf18   : > { %v2213_v51 = vsub.f32 1.5, %v2212_v46 }
 0xf1a   : > { %v2879_v55 = vpop.eup %2878  ;;  %v2214_v1 = vmul.f32 %v2877_v16, %v2213_v51 }
 0xf1b   : > { %v2220_v42 = vmul.f32 %v2879_v55, %v2208_v20  ;;  %vm2226_vm11 = vweird.f32 %v2879_v55 }
 0xf1c   : > { %v2218_v33 = vsel %vm2217_vm10, %v2877_v16, %v2214_v1  ;;  %vm2227_vm7 = vmor %vm2225_vm6, %vm2226_vm11 }
 0xf1d   : > { %v2221_v10 = vmul.f32 %v2879_v55, %v2220_v42  ;;  %v2229_v44 = vmul.f32 %v2218_v33, %v3974_v4 }
 0xf1f   : > { %v2222_v53 = vmul.f32 0.5, %v2221_v10  ;;  %v2234_v49 = vmul.f32 %v2788_v17, %v2229_v44 }
 0xf21   : > { %v2223_v38 = vsub.f32 1.5, %v2222_v53  ;;  %2705 = vmatmul.msk.f32.vlgmr.msrb.gmra.mxu2 %vm562_vm0, %v2234_v49  ;;  %2707 = vmatmul.msk.f32.vlgmr.msra.gmra.mxu0 %vm562_vm0, %v2234_v49 }
 0xf23   : > { %v2224_v0 = vmul.f32 %v2879_v55, %v2223_v38 }
 0xf25   : > { %v2228_v21 = vsel %vm2227_vm7, %v2879_v55, %v2224_v0 }
 0xf26   : > { %v2230_v30 = vmul.f32 %v2228_v21, %v3980_v3 }
 0xf28   : > { %v2235_v23 = vmul.f32 %v2788_v17, %v2230_v30 }
 0xf2a   : > { %2706 = vmatmul.msk.f32.gmra.mxu2 %vm562_vm0, %v2235_v23  ;;  %2708 = vmatmul.msk.f32.gmra.mxu0 %vm562_vm0, %v2235_v23 }
 0xf9e   : > { %v2299_v40 = vpop.f32.mrf.mxu0 }
 0xfa4   : > { %v2276_v47 = vpop.f32.mrf.mxu2 }
 0xfa5   : > { %v2709_v50 = vmul.f32 -1.442695, %v2276_v47 }
 0xfa7   : > { %2880 = vpow2.f32 %v2709_v50  ;;  %v2302_v1 = vpop.f32.mrf.mxu0 }
 0xfad   : > { %v2881_v56 = vpop.eup %2880  ;;  %v2279_v39 = vpop.f32.mrf.mxu2 }
 0xfae   : > { %v2311_v32 = vadd.f32 1.0, %v2881_v56  ;;  %v2710_v48 = vmul.f32 -1.442695, %v2279_v39 }
 0xfb0   : > { %2882 = vrcp.f32 %v2311_v32  ;;  %v2324_v7 = vand.u32 2147483648, %v2311_v32  ;;  %v2322_v18 = vand.u32 2147483647, %v2311_v32  ;;  %vm2318_vm12 = vweird.f32 %v2311_v32 }
 0xfb1   : > { %2884 = vpow2.f32 %v2710_v48 }
 0xfb2   : > { %v2325_v22 = vor.u32 1.1754944e-38, %v2324_v7  ;;  %vm2323_vm14 = vcmp.eq.f32.partialorder %v2322_v18, 8.507059e+37 }
 0xfb6   : > { %v2883_v19 = vpop.eup %2882 }
 0xfb7   : > { %v2885_v6 = vpop.eup %2884  ;;  %v2314_v60 = vmul.f32 %v2883_v19, %v2311_v32  ;;  %vm2319_vm0 = vweird.f32 %v2883_v19 }
 0xfb8   : > { %v2312_v62 = vadd.f32 1.0, %v2885_v6  ;;  %vm2320_vm13 = vmor %vm2318_vm12, %vm2319_vm0 }
 0xfb9   : > { %v2315_v25 = vsub.f32 1.0, %v2314_v60 }
 0xfba   : > { %2886 = vrcp.f32 %v2312_v62  ;;  %v2339_v29 = vand.u32 2147483648, %v2312_v62  ;;  %v2337_v45 = vand.u32 2147483647, %v2312_v62  ;;  %vm2333_vm1 = vweird.f32 %v2312_v62 }
 0xfbb   : > { %v2316_v15 = vmul.f32 %v2883_v19, %v2315_v25 }
 0xfbc   : > { %v2340_v13 = vor.u32 1.1754944e-38, %v2339_v29  ;;  %vm2338_vm3 = vcmp.eq.f32.partialorder %v2337_v45, 8.507059e+37 }
 0xfbd   : > { %v2317_v12 = vadd.f32 %v2883_v19, %v2316_v15 }
 0xfbf   : > { %v2321_v58 = vsel %vm2320_vm13, %v2883_v19, %v2317_v12 }
 0xfc0   : > { %v2887_v11 = vpop.eup %2886  ;;  %v2326_v52 = vsel %vm2323_vm14, %v2325_v22, %v2321_v58 }
 0xfc1   : > { %v2343_v35 = vmul.f32 %v2326_v52, %v2276_v47  ;;  %v2329_v14 = vmul.f32 %v2887_v11, %v2312_v62  ;;  %vm2334_vm15 = vweird.f32 %v2887_v11 }
 0xfc2   : > { %vm2335_vm2 = vmor %vm2333_vm1, %vm2334_vm15 }
 0xfc3   : > { %v2345_v61 = vmul.f32 %v2343_v35, %v2299_v40  ;;  %v2330_v8 = vsub.f32 1.0, %v2329_v14 }
 0xfc5   : > { %v2331_v16 = vmul.f32 %v2887_v11, %v2330_v8  ;;  %2380 = vmatmul.f32.vlgmr.msra.gmra.mxu2 %v2345_v61 }
 0xfc7   : > { %v2332_v20 = vadd.f32 %v2887_v11, %v2331_v16 }
 0xfc9   : > { %v2336_v46 = vsel %vm2335_vm2, %v2887_v11, %v2332_v20 }
 0xfca   : > { %v2341_v51 = vsel %vm2338_vm3, %v2340_v13, %v2336_v46 }
 0xfcb   : > { %v2344_v55 = vmul.f32 %v2341_v51, %v2279_v39 }
 0xfcd   : > { %v2346_v42 = vmul.f32 %v2344_v55, %v2302_v1 }
 0xfcf   : > { %2383 = vmatmul.f32.gmra.mxu2 %v2346_v42 }
0x1048   : > { %v2381_v17 = vpop.f32.mrf.mxu2 }
0x1049   : > { %v2387_v10 = vadd.f32 %v2381_v17, %v3974_v4 }
0x104b   : > { %v2389_v49 = vmul.f32 %v2387_v10, %v2387_v10 }
0x1052   : > { %v2384_v33 = vpop.f32.mrf.mxu2 }
0x1053   : > { %v2388_v44 = vadd.f32 %v2384_v33, %v3980_v3 }
0x1055   : > { %v2390_v53 = vmul.f32 %v2388_v44, %v2388_v44 }
0x1057   : > { %v2393_v38 = vrot.slane %v2390_v53, 7 }
0x1059   : > { %v2395_v0 = vsel %vm2394_vm4, %v2393_v38, %v2389_v49 }
0x105a   : > { %v2398_v21 = vsel %vm2397_vm5, %v2395_v0, 0.0 }
0x105b   : > { %2399 = vadd.xlane.f32.xlu2 %v2398_v21 }
0x10ce   : > { %v2400_v30 = vpop.xlane.xlu2 %2399 }
0x10cf   : > { %v2401_v23 = vmul.f32 %v2400_v30, %v3058_v28 }
0x10d1   : > { %v2402_v24 = vadd.f32 1e-05, %v2401_v23 }
0x10d3   : > { %2888 = vrsqrt.f32 %v2402_v24  ;;  %vm2409_vm9 = vweird.f32 %v2402_v24 }
0x10d9   : > { %v2889_v26 = vpop.eup %2888 }
0x10da   : > { %v2404_v4 = vmul.f32 %v2889_v26, %v2402_v24  ;;  %vm2410_vm8 = vweird.f32 %v2889_v26 }
0x10db   : > { %vm2411_vm10 = vmor %vm2409_vm9, %vm2410_vm8 }
0x10dc   : > { %v2405_v41 = vmul.f32 %v2889_v26, %v2404_v4 }
0x10de   : > { %v2406_v3 = vmul.f32 0.5, %v2405_v41 }
0x10e0   : > { %v2407_v31 = vsub.f32 1.5, %v2406_v3 }
0x10e2   : > { %v2408_v34 = vmul.f32 %v2889_v26, %v2407_v31 }
0x10e4   : > { %v2412_v36 = vsel %vm2411_vm10, %v2889_v26, %v2408_v34 }
0x10e5   : > { %v2414_v54 = vrot.slane %v2412_v36, 1  ;;  %v2417_v59 = vmul.f32 %v2412_v36, %v2387_v10 }
0x10e7   : > { %v2418_v27 = vmul.f32 %v2414_v54, %v2388_v44  ;;  %v2423_v28 = vmul.f32 %v2789_v57, %v2417_v59 }
0x10e9   : > { %v2424_v2 = vmul.f32 %v2789_v57, %v2418_v27 }
0x10eb   : > { %v2427_v43 = vrot.slane %v2424_v2, 7 }
0x10ed   : > { %v2428_v63 = vsel %vm2394_vm4, %v2427_v43, %v2423_v28 }
0x10ee   : > { %2430 = vst.msk [vmem:[%s532_s19] sm:$0x3] %vm2397_vm5, %v2428_v63 }
0x10ef PF: > { %s21_s17 = sadd.s32 1, %s2922_s17  }
0x10f0   : > { %p18_p4 = scmp.ge.s32.totalorder %s21_s17, 4  }
0x10f2   :  { %20 = sbr.rel (!%p18_p4) target bundleno = 1 (0x1), region = 124 }

</bundles_post_ra>
